<compile_context>
chip_gen: v6e
topology: v6e:2x2x1
jax: 0.10.0
libtpu: 0.0.40
codegen_flags: <defaults>
</compile_context>

<pallas_src>
import jax
import jax.numpy as jnp
import numpy as np
from jax import lax
from jax.experimental import pallas as pl
from jax.experimental.pallas import tpu as pltpu


# ----------------------------- Pallas kernels ------------------------------
#
# Per-direction gate column order (permuted from PyTorch's i,f,g,o):
#   [ i | f | o | g ]   -> sigmoid slab = cols [0,3H), tanh slab = [3H,4H)


def _precompute_input_gates(x_ref, wih_ref, b_ref, gf_ref, gb_ref):
    """Hoisted input projections: one big matmul per direction fills the
    per-timestep input-gate preactivation scratches (T, B, 4H)."""
    T, B, E = x_ref.shape
    H4 = gf_ref.shape[-1]
    # B == 8 (one sublane group) -> collapsing (T,B) is layout preserving.
    x_all = x_ref[...].reshape(T * B, E)
    gf_ref[...] = (jnp.dot(x_all, wih_ref[0], preferred_element_type=jnp.float32)
                   + b_ref[0]).reshape(T, B, H4)
    gb_ref[...] = (jnp.dot(x_all, wih_ref[1], preferred_element_type=jnp.float32)
                   + b_ref[1]).reshape(T, B, H4)


def _lstm_step(t, h_f, c_f, h_b, c_b, gf_ref, gb_ref, whh_f, whh_b,
               lens, rev_start, T, H):
    """One fwd + one bwd LSTM step. Only h @ W_hh is on the recurrent path."""
    gates_f = gf_ref[t] + jnp.dot(h_f, whh_f,
                                  preferred_element_type=jnp.float32)
    gates_b = gb_ref[T - 1 - t] + jnp.dot(h_b, whh_b,
                                          preferred_element_type=jnp.float32)

    def cell(gates, c):
        sg = jax.nn.sigmoid(gates[:, :3 * H])      # [i | f | o]
        g = jnp.tanh(gates[:, 3 * H:])             # [g]
        i, f, o = sg[:, :H], sg[:, H:2 * H], sg[:, 2 * H:3 * H]
        c_new = f * c + i * g
        return o * jnp.tanh(c_new), c_new

    hf_new, cf_new = cell(gates_f, c_f)
    hb_new, cb_new = cell(gates_b, c_b)
    # packed-sequence gating: fwd valid while t < len, bwd while (T-1-t) < len
    mask_f = t < lens
    mask_b = t >= rev_start
    return hf_new, cf_new, hb_new, cb_new, mask_f, mask_b


def bilstm_fc_kernel(len_ref, x_ref, wih_ref, whh_ref, b_ref, fcw_ref,
                     fcb_ref, out_ref, gf_ref, gb_ref):
    """Last bidirectional LSTM layer + FC, whole sequence in one invocation."""
    T, B, _ = x_ref.shape
    H = whh_ref.shape[1]

    _precompute_input_gates(x_ref, wih_ref, b_ref, gf_ref, gb_ref)

    whh_f = whh_ref[0]
    whh_b = whh_ref[1]
    lens = jnp.broadcast_to(len_ref[...], (B, H))        # (B, H) int32
    rev_start = T - lens

    def step(t, carry):
        h_f, c_f, h_b, c_b = carry
        hf_new, cf_new, hb_new, cb_new, m_f, m_b = _lstm_step(
            t, h_f, c_f, h_b, c_b, gf_ref, gb_ref, whh_f, whh_b,
            lens, rev_start, T, H)
        return (jnp.where(m_f, hf_new, h_f), jnp.where(m_f, cf_new, c_f),
                jnp.where(m_b, hb_new, h_b), jnp.where(m_b, cb_new, c_b))

    z = jnp.zeros((B, H), jnp.float32)
    h_f, _, h_b, _ = lax.fori_loop(0, T, step, (z, z, z, z),
                                   unroll=True if T <= 32 else 8)

    # hidden = [h_fwd_final | h_bwd_final]; dropout = identity (eval).
    # FC folded in with fc_w pre-split per direction (no concat needed).
    out_ref[...] = (jnp.dot(h_f, fcw_ref[0], preferred_element_type=jnp.float32)
                    + jnp.dot(h_b, fcw_ref[1], preferred_element_type=jnp.float32)
                    + fcb_ref[...]).astype(out_ref.dtype)


def bilstm_layer_kernel(len_ref, x_ref, wih_ref, whh_ref, b_ref, out_ref,
                        gf_ref, gb_ref):
    """Non-final bidirectional LSTM layer: single lane-dense (T,B,2H) output
    (fwd half in cols [:H], bwd half in cols [H:]); padding rows are zero."""
    T, B, _ = x_ref.shape
    H = whh_ref.shape[1]

    _precompute_input_gates(x_ref, wih_ref, b_ref, gf_ref, gb_ref)

    whh_f = whh_ref[0]
    whh_b = whh_ref[1]
    lens = jnp.broadcast_to(len_ref[...], (B, H))
    rev_start = T - lens

    def step(t, carry):
        h_f, c_f, h_b, c_b = carry
        hf_new, cf_new, hb_new, cb_new, m_f, m_b = _lstm_step(
            t, h_f, c_f, h_b, c_b, gf_ref, gb_ref, whh_f, whh_b,
            lens, rev_start, T, H)
        # pad_packed_sequence semantics: padded positions are zero.
        out_ref[t, :, :H] = jnp.where(m_f, hf_new, 0.0)
        out_ref[T - 1 - t, :, H:] = jnp.where(m_b, hb_new, 0.0)
        return (jnp.where(m_f, hf_new, h_f), jnp.where(m_f, cf_new, c_f),
                jnp.where(m_b, hb_new, h_b), jnp.where(m_b, cb_new, c_b))

    z = jnp.zeros((B, H), jnp.float32)
    lax.fori_loop(0, T, step, (z, z, z, z), unroll=True if T <= 32 else 8)


# ------------------------------ Wrappers ------------------------------------


def _layer_in_specs(T, B, E, H):
    H4 = 4 * H
    return [
        pl.BlockSpec((B, 1), lambda i: (0, 0)),           # lengths (int32)
        pl.BlockSpec((T, B, E), lambda i: (0, 0, 0)),     # x (time-major)
        pl.BlockSpec((2, E, H4), lambda i: (0, 0, 0)),    # W_ih [fwd, bwd]
        pl.BlockSpec((2, H, H4), lambda i: (0, 0, 0)),    # W_hh [fwd, bwd]
        pl.BlockSpec((2, 1, H4), lambda i: (0, 0, 0)),    # bias [fwd, bwd]
    ]


def _layer_scratch(T, B, H):
    # Hoisted per-timestep input-gate preactivations (one scratch per dir).
    return [pltpu.VMEM((T, B, 4 * H), jnp.float32),
            pltpu.VMEM((T, B, 4 * H), jnp.float32)]


def bilstm_last_layer_fc(x, lengths, wih, whh, b, fc_w, fc_b):
    """x: (T,B,E) f32 -> logits (B, OUT)."""
    T, B, E = x.shape
    H = whh.shape[1]
    OUT = fc_w.shape[2]
    len2d = lengths.reshape(B, 1).astype(jnp.int32)
    return pl.pallas_call(
        bilstm_fc_kernel,
        out_shape=jax.ShapeDtypeStruct((B, OUT), jnp.float32),
        grid=(1,),
        in_specs=_layer_in_specs(T, B, E, H) + [
            pl.BlockSpec((2, H, OUT), lambda i: (0, 0, 0)),   # fc_w per dir
            pl.BlockSpec((1, OUT), lambda i: (0, 0)),         # fc bias
        ],
        out_specs=pl.BlockSpec((B, OUT), lambda i: (0, 0)),
        scratch_shapes=_layer_scratch(T, B, H),
        compiler_params=pltpu.CompilerParams(
            dimension_semantics=("arbitrary",)),
    )(len2d, x, wih, whh, b, fc_w, fc_b.reshape(1, OUT))


def bilstm_layer(x, lengths, wih, whh, b):
    """Non-final layer: lane-dense padded per-step outputs (T, B, 2H)."""
    T, B, E = x.shape
    H = whh.shape[1]
    len2d = lengths.reshape(B, 1).astype(jnp.int32)
    return pl.pallas_call(
        bilstm_layer_kernel,
        out_shape=jax.ShapeDtypeStruct((T, B, 2 * H), jnp.float32),
        grid=(1,),
        in_specs=_layer_in_specs(T, B, E, H),
        out_specs=pl.BlockSpec((T, B, 2 * H), lambda i: (0, 0, 0)),
        scratch_shapes=_layer_scratch(T, B, H),
        compiler_params=pltpu.CompilerParams(
            dimension_semantics=("arbitrary",)),
    )(len2d, x, wih, whh, b)


def textrnn_forward(text, text_lengths, fused):
    """text: (T, B) int32; text_lengths: (B,) int32 (sorted descending)."""
    x = jnp.take(fused["emb"], text, axis=0)   # (T,B,E); dropout = id (eval)
    for layer in fused["layers"][:-1]:          # inter-layer dropout = id (eval)
        x = bilstm_layer(x, text_lengths, layer["wih"], layer["whh"],
                         layer["b"])
    last = fused["layers"][-1]
    return bilstm_last_layer_fc(x, text_lengths, last["wih"], last["whh"],
                                last["b"], fused["fc_w"], fused["fc_b"])


# --------------------- Weight fusion (host-side, once) -----------------------


def _permute_gates(w, H):
    """PyTorch gate order (i, f, g, o) -> kernel order (i, f, o, g)."""
    i, f, g, o = (w[..., 0:H], w[..., H:2 * H], w[..., 2 * H:3 * H],
                  w[..., 3 * H:4 * H])
    return jnp.concatenate([i, f, o, g], axis=-1)


def prepare_fused_params(params):
    """Dense per-direction weights stacked on a leading [fwd, bwd] axis
    (no zero-padded blocks)."""
    layers = []
    for layer in params["layers"]:
        wih_f, whh_f, b_f = layer["fwd"]
        wih_b, whh_b, b_b = layer["bwd"]
        H = whh_f.shape[0]
        layers.append({
            "wih": jnp.stack([_permute_gates(wih_f, H),
                              _permute_gates(wih_b, H)]),       # (2, E, 4H)
            "whh": jnp.stack([_permute_gates(whh_f, H),
                              _permute_gates(whh_b, H)]),       # (2, H, 4H)
            # NOTE: when loading real PyTorch weights, b must be bias_ih + bias_hh.
            "b": jnp.stack([_permute_gates(b_f, H),
                            _permute_gates(b_b, H)]).reshape(2, 1, 4 * H),
        })
    H = params["layers"][-1]["fwd"][1].shape[0]
    fc_w = params["fc_w"]                                        # (2H, OUT)
    return {"emb": params["emb"], "layers": layers,
            "fc_w": jnp.stack([fc_w[:H], fc_w[H:]]),             # (2, H, OUT)
            "fc_b": params["fc_b"]}


# --------------------------- Pure-JAX reference ------------------------------


def lstm_ref_direction(x, lengths, wih, whh, b, *, reverse):
    T, B, _ = x.shape
    H = whh.shape[0]
    order = jnp.arange(T)[::-1] if reverse else jnp.arange(T)

    def step(carry, t):
        h, c = carry
        gates = x[t] @ wih + h @ whh + b
        i = jax.nn.sigmoid(gates[:, :H])
        f = jax.nn.sigmoid(gates[:, H:2 * H])
        g = jnp.tanh(gates[:, 2 * H:3 * H])
        o = jax.nn.sigmoid(gates[:, 3 * H:])
        c_new = f * c + i * g
        h_new = o * jnp.tanh(c_new)
        m = (t < lengths)[:, None]
        h = jnp.where(m, h_new, h)
        c = jnp.where(m, c_new, c)
        return (h, c), (t, jnp.where(m, h_new, 0.0))

    (h, _), (tidx, outs) = jax.lax.scan(
        step, (jnp.zeros((B, H)), jnp.zeros((B, H))), order)
    out_full = jnp.zeros((T, B, H)).at[tidx].set(outs)
    return out_full, h


def textrnn_ref(text, text_lengths, params):
    x = jnp.take(params["emb"], text, axis=0)
    h_f = h_b = None
    for layer in params["layers"]:
        out_f, h_f = lstm_ref_direction(x, text_lengths, *layer["fwd"],
                                        reverse=False)
        out_b, h_b = lstm_ref_direction(x, text_lengths, *layer["bwd"],
                                        reverse=True)
        x = jnp.concatenate([out_f, out_b], axis=-1)
    hidden = jnp.concatenate([h_f, h_b], axis=-1)
    return hidden @ params["fc_w"] + params["fc_b"]


# --------------------------- Parameter init ----------------------------------


def init_params(key, *, vocab_size, embedding_dim, hidden_size, num_layers,
                output_dim, pad_idx):
    H = hidden_size
    keys = iter(jax.random.split(key, 4 + 8 * num_layers))

    emb = 0.1 * jax.random.normal(next(keys), (vocab_size, embedding_dim),
                                  jnp.float32)
    emb = emb.at[pad_idx].set(0.0)                     # padding_idx row = 0

    layers = []
    in_size = embedding_dim
    for _ in range(num_layers):
        layer = {}
        for name in ("fwd", "bwd"):
            wih = jax.random.normal(next(keys), (in_size, 4 * H),
                                    jnp.float32) * np.sqrt(2.0 / in_size)
            whh = jax.random.normal(next(keys), (H, 4 * H),
                                    jnp.float32) * (1.0 / np.sqrt(H))
            # bias_ih = 0, bias_hh = 0 except forget-gate chunk set to 1
            bias = jnp.zeros((4 * H,), jnp.float32).at[H:2 * H].set(1.0)
            layer[name] = (wih, whh, bias)
        layers.append(layer)
        in_size = 2 * H

    fc_w = jax.random.normal(next(keys), (2 * H, output_dim),
                             jnp.float32) * (1.0 / np.sqrt(2 * H))
    fc_b = jnp.zeros((output_dim,), jnp.float32)

    return {"emb": emb, "layers": layers, "fc_w": fc_w, "fc_b": fc_b}


# --------------------------------- Main --------------------------------------


if __name__ == "__main__":
    VOCAB, EMB, HID, OUT, PAD = 50, 32, 32, 4, 0
    T, B = 12, 8

    key = jax.random.PRNGKey(0)
    k_text, k_p1, k_p2 = jax.random.split(key, 3)

    # lengths sorted descending (pack_padded_sequence enforce_sorted=True)
    lengths = jnp.array([12, 11, 10, 9, 7, 5, 3, 2], dtype=jnp.int32)
    text = jax.random.randint(k_text, (T, B), 1, VOCAB, dtype=jnp.int32)
    pad_mask = jnp.arange(T)[:, None] < lengths[None, :]
    text = jnp.where(pad_mask, text, PAD)

    fwd = jax.jit(textrnn_forward)

    # Validate both the 1-layer (last-layer+FC kernel only) and the 2-layer
    # path (non-final-layer kernel + lane-dense inter-layer output).
    for n_layers, k_params in ((1, k_p1), (2, k_p2)):
        params = init_params(k_params, vocab_size=VOCAB, embedding_dim=EMB,
                             hidden_size=HID, num_layers=n_layers,
                             output_dim=OUT, pad_idx=PAD)
        fused_params = prepare_fused_params(params)

        logits = fwd(text, lengths, fused_params)
        jax.block_until_ready(logits)

        ref = textrnn_ref(text, lengths, params)
        np.testing.assert_allclose(np.asarray(logits), np.asarray(ref),
                                   rtol=1e-3, atol=1e-3)

    print("KERNEL_OK")
</pallas_src>

<mosaic_0001>
module attributes {stable_mosaic.version = 11 : i64} {
  func.func @bilstm_fc_kernel(%arg0: i32, %arg1: memref<8x1xi32, #tpu.memory_space<vmem>>, %arg2: memref<12x8x32xf32, #tpu.memory_space<vmem>>, %arg3: memref<2x32x128xf32, #tpu.memory_space<vmem>>, %arg4: memref<2x32x128xf32, #tpu.memory_space<vmem>>, %arg5: memref<2x1x128xf32, #tpu.memory_space<vmem>>, %arg6: memref<2x32x4xf32, #tpu.memory_space<vmem>>, %arg7: memref<1x4xf32, #tpu.memory_space<vmem>>, %arg8: memref<8x4xf32, #tpu.memory_space<vmem>>, %arg9: memref<12x8x128xf32, #tpu.memory_space<vmem>>, %arg10: memref<12x8x128xf32, #tpu.memory_space<vmem>>) attributes {dimension_semantics = [#tpu.dimension_semantics<arbitrary>], iteration_bounds = array<i64: 1>, scalar_prefetch = 0 : i64, scratch_operands = 2 : i64, tpu.core_type = #tpu.core_type<tc>, window_params = [{pipeline_mode = #tpu.pipeline_mode<synchronous>, transform_indices = @transform_0, window_bounds = array<i64: 8, 1>}, {pipeline_mode = #tpu.pipeline_mode<synchronous>, transform_indices = @transform_1, window_bounds = array<i64: 12, 8, 32>}, {pipeline_mode = #tpu.pipeline_mode<synchronous>, transform_indices = @transform_2, window_bounds = array<i64: 2, 32, 128>}, {pipeline_mode = #tpu.pipeline_mode<synchronous>, transform_indices = @transform_3, window_bounds = array<i64: 2, 32, 128>}, {pipeline_mode = #tpu.pipeline_mode<synchronous>, transform_indices = @transform_4, window_bounds = array<i64: 2, 1, 128>}, {pipeline_mode = #tpu.pipeline_mode<synchronous>, transform_indices = @transform_5, window_bounds = array<i64: 2, 32, 4>}, {pipeline_mode = #tpu.pipeline_mode<synchronous>, transform_indices = @transform_6, window_bounds = array<i64: 1, 4>}, {pipeline_mode = #tpu.pipeline_mode<synchronous>, transform_indices = @transform_7, window_bounds = array<i64: 8, 4>}]} {
    %c0 = arith.constant 0 : index
    %c0_0 = arith.constant 0 : index
    %c0_1 = arith.constant 0 : index
    %0 = vector.load %arg2[%c0, %c0_0, %c0_1] : memref<12x8x32xf32, #tpu.memory_space<vmem>>, vector<12x8x32xf32>
    %1 = vector.shape_cast %0 : vector<12x8x32xf32> to vector<96x32xf32>
    %c0_2 = arith.constant 0 : index
    %c0_3 = arith.constant 0 : index
    %c0_4 = arith.constant 0 : index
    %2 = vector.load %arg3[%c0_2, %c0_3, %c0_4] : memref<2x32x128xf32, #tpu.memory_space<vmem>>, vector<1x32x128xf32>
    %3 = vector.shape_cast %2 : vector<1x32x128xf32> to vector<32x128xf32>
    %cst = arith.constant dense<0.000000e+00> : vector<96x128xf32>
    %4 = tpu.matmul %1, %3, %cst {dimension_numbers = #tpu.dot_dimension_numbers<[1], [0], [0], [1], [0, 0, 1, 1], [], []>} : vector<96x32xf32>, vector<32x128xf32>, vector<96x128xf32> -> vector<96x128xf32>
    %c0_5 = arith.constant 0 : index
    %c0_6 = arith.constant 0 : index
    %c0_7 = arith.constant 0 : index
    %5 = vector.load %arg5[%c0_5, %c0_6, %c0_7] : memref<2x1x128xf32, #tpu.memory_space<vmem>>, vector<1x1x128xf32>
    %6 = vector.shape_cast %5 : vector<1x1x128xf32> to vector<1x128xf32>
    %7 = vector.broadcast %6 : vector<1x128xf32> to vector<96x128xf32>
    %8 = arith.addf %4, %7 : vector<96x128xf32>
    %9 = vector.shape_cast %8 : vector<96x128xf32> to vector<12x8x128xf32>
    %c0_8 = arith.constant 0 : index
    %c0_9 = arith.constant 0 : index
    %c0_10 = arith.constant 0 : index
    %10 = vector.load %arg9[%c0_8, %c0_9, %c0_10] : memref<12x8x128xf32, #tpu.memory_space<vmem>>, vector<12x8x128xf32>
    tpu.vector_store %arg9[%c0_8, %c0_9, %c0_10], %9 {strides = array<i32>} : memref<12x8x128xf32, #tpu.memory_space<vmem>>, vector<12x8x128xf32>,
    %c1 = arith.constant 1 : index
    %c0_11 = arith.constant 0 : index
    %c0_12 = arith.constant 0 : index
    %11 = vector.load %arg3[%c1, %c0_11, %c0_12] : memref<2x32x128xf32, #tpu.memory_space<vmem>>, vector<1x32x128xf32>
    %12 = vector.shape_cast %11 : vector<1x32x128xf32> to vector<32x128xf32>
    %cst_13 = arith.constant dense<0.000000e+00> : vector<96x128xf32>
    %13 = tpu.matmul %1, %12, %cst_13 {dimension_numbers = #tpu.dot_dimension_numbers<[1], [0], [0], [1], [0, 0, 1, 1], [], []>} : vector<96x32xf32>, vector<32x128xf32>, vector<96x128xf32> -> vector<96x128xf32>
    %c1_14 = arith.constant 1 : index
    %c0_15 = arith.constant 0 : index
    %c0_16 = arith.constant 0 : index
    %14 = vector.load %arg5[%c1_14, %c0_15, %c0_16] : memref<2x1x128xf32, #tpu.memory_space<vmem>>, vector<1x1x128xf32>
    %15 = vector.shape_cast %14 : vector<1x1x128xf32> to vector<1x128xf32>
    %16 = vector.broadcast %15 : vector<1x128xf32> to vector<96x128xf32>
    %17 = arith.addf %13, %16 : vector<96x128xf32>
    %18 = vector.shape_cast %17 : vector<96x128xf32> to vector<12x8x128xf32>
    %c0_17 = arith.constant 0 : index
    %c0_18 = arith.constant 0 : index
    %c0_19 = arith.constant 0 : index
    %19 = vector.load %arg10[%c0_17, %c0_18, %c0_19] : memref<12x8x128xf32, #tpu.memory_space<vmem>>, vector<12x8x128xf32>
    tpu.vector_store %arg10[%c0_17, %c0_18, %c0_19], %18 {strides = array<i32>} : memref<12x8x128xf32, #tpu.memory_space<vmem>>, vector<12x8x128xf32>,
    %c0_20 = arith.constant 0 : index
    %c0_21 = arith.constant 0 : index
    %c0_22 = arith.constant 0 : index
    %20 = vector.load %arg4[%c0_20, %c0_21, %c0_22] : memref<2x32x128xf32, #tpu.memory_space<vmem>>, vector<1x32x128xf32>
    %21 = vector.shape_cast %20 : vector<1x32x128xf32> to vector<32x128xf32>
    %c1_23 = arith.constant 1 : index
    %c0_24 = arith.constant 0 : index
    %c0_25 = arith.constant 0 : index
    %22 = vector.load %arg4[%c1_23, %c0_24, %c0_25] : memref<2x32x128xf32, #tpu.memory_space<vmem>>, vector<1x32x128xf32>
    %23 = vector.shape_cast %22 : vector<1x32x128xf32> to vector<32x128xf32>
    %c0_26 = arith.constant 0 : index
    %c0_27 = arith.constant 0 : index
    %24 = vector.load %arg1[%c0_26, %c0_27] : memref<8x1xi32, #tpu.memory_space<vmem>>, vector<8x1xi32>
    %25 = vector.shape_cast %24 : vector<8x1xi32> to vector<8x1xi32>
    %26 = vector.broadcast %25 : vector<8x1xi32> to vector<8x32xi32>
    %c12_i32 = arith.constant 12 : i32
    %27 = vector.broadcast %c12_i32 : i32 to vector<8x32xi32>
    %28 = arith.subi %27, %26 : vector<8x32xi32>
    %cst_28 = arith.constant 0.000000e+00 : f32
    %29 = vector.broadcast %cst_28 : f32 to vector<8x32xf32>
    %c0_i32 = arith.constant 0 : i32
    %30 = arith.index_cast %c0_i32 : i32 to index
    %c0_29 = arith.constant 0 : index
    %c0_30 = arith.constant 0 : index
    %31 = vector.load %arg9[%30, %c0_29, %c0_30] : memref<12x8x128xf32, #tpu.memory_space<vmem>>, vector<1x8x128xf32>
    %32 = vector.shape_cast %31 : vector<1x8x128xf32> to vector<8x128xf32>
    %cst_31 = arith.constant dense<0.000000e+00> : vector<8x128xf32>
    %33 = tpu.matmul %29, %21, %cst_31 {dimension_numbers = #tpu.dot_dimension_numbers<[1], [0], [0], [1], [0, 0, 1, 1], [], []>} : vector<8x32xf32>, vector<32x128xf32>, vector<8x128xf32> -> vector<8x128xf32>
    %34 = arith.addf %32, %33 : vector<8x128xf32>
    %c11_i32 = arith.constant 11 : i32
    %35 = arith.subi %c11_i32, %c0_i32 : i32
    %36 = arith.index_cast %35 : i32 to index
    %c0_32 = arith.constant 0 : index
    %c0_33 = arith.constant 0 : index
    %37 = vector.load %arg10[%36, %c0_32, %c0_33] : memref<12x8x128xf32, #tpu.memory_space<vmem>>, vector<1x8x128xf32>
    %38 = vector.shape_cast %37 : vector<1x8x128xf32> to vector<8x128xf32>
    %cst_34 = arith.constant dense<0.000000e+00> : vector<8x128xf32>
    %39 = tpu.matmul %29, %23, %cst_34 {dimension_numbers = #tpu.dot_dimension_numbers<[1], [0], [0], [1], [0, 0, 1, 1], [], []>} : vector<8x32xf32>, vector<32x128xf32>, vector<8x128xf32> -> vector<8x128xf32>
    %40 = arith.addf %38, %39 : vector<8x128xf32>
    %41 = vector.extract_strided_slice %34 {offsets = [0, 0], sizes = [8, 96], strides = [1, 1]} : vector<8x128xf32> to vector<8x96xf32>
    %42 = arith.negf %41 : vector<8x96xf32>
    %43 = math.exp %42 : vector<8x96xf32>
    %cst_35 = arith.constant 1.000000e+00 : f32
    %44 = vector.broadcast %cst_35 : f32 to vector<8x96xf32>
    %45 = arith.addf %44, %43 : vector<8x96xf32>
    %46 = arith.divf %44, %45 : vector<8x96xf32>
    %47 = vector.extract_strided_slice %34 {offsets = [0, 96], sizes = [8, 32], strides = [1, 1]} : vector<8x128xf32> to vector<8x32xf32>
    %48 = math.tanh %47 : vector<8x32xf32>
    %49 = vector.extract_strided_slice %46 {offsets = [0, 0], sizes = [8, 32], strides = [1, 1]} : vector<8x96xf32> to vector<8x32xf32>
    %50 = vector.extract_strided_slice %46 {offsets = [0, 32], sizes = [8, 32], strides = [1, 1]} : vector<8x96xf32> to vector<8x32xf32>
    %51 = vector.extract_strided_slice %46 {offsets = [0, 64], sizes = [8, 32], strides = [1, 1]} : vector<8x96xf32> to vector<8x32xf32>
    %52 = arith.mulf %50, %29 : vector<8x32xf32>
    %53 = arith.mulf %49, %48 : vector<8x32xf32>
    %54 = arith.addf %52, %53 : vector<8x32xf32>
    %55 = math.tanh %54 : vector<8x32xf32>
    %56 = arith.mulf %51, %55 : vector<8x32xf32>
    %57 = vector.extract_strided_slice %40 {offsets = [0, 0], sizes = [8, 96], strides = [1, 1]} : vector<8x128xf32> to vector<8x96xf32>
    %58 = arith.negf %57 : vector<8x96xf32>
    %59 = math.exp %58 : vector<8x96xf32>
    %cst_36 = arith.constant 1.000000e+00 : f32
    %60 = vector.broadcast %cst_36 : f32 to vector<8x96xf32>
    %61 = arith.addf %60, %59 : vector<8x96xf32>
    %62 = arith.divf %60, %61 : vector<8x96xf32>
    %63 = vector.extract_strided_slice %40 {offsets = [0, 96], sizes = [8, 32], strides = [1, 1]} : vector<8x128xf32> to vector<8x32xf32>
    %64 = math.tanh %63 : vector<8x32xf32>
    %65 = vector.extract_strided_slice %62 {offsets = [0, 0], sizes = [8, 32], strides = [1, 1]} : vector<8x96xf32> to vector<8x32xf32>
    %66 = vector.extract_strided_slice %62 {offsets = [0, 32], sizes = [8, 32], strides = [1, 1]} : vector<8x96xf32> to vector<8x32xf32>
    %67 = vector.extract_strided_slice %62 {offsets = [0, 64], sizes = [8, 32], strides = [1, 1]} : vector<8x96xf32> to vector<8x32xf32>
    %68 = arith.mulf %66, %29 : vector<8x32xf32>
    %69 = arith.mulf %65, %64 : vector<8x32xf32>
    %70 = arith.addf %68, %69 : vector<8x32xf32>
    %71 = math.tanh %70 : vector<8x32xf32>
    %72 = arith.mulf %67, %71 : vector<8x32xf32>
    %73 = vector.broadcast %c0_i32 : i32 to vector<8x32xi32>
    %74 = arith.cmpi slt, %73, %26 : vector<8x32xi32>
    %75 = vector.broadcast %c0_i32 : i32 to vector<8x32xi32>
    %76 = arith.cmpi sge, %75, %28 : vector<8x32xi32>
    %77 = arith.select %74, %56, %29 : vector<8x32xi1>, vector<8x32xf32>
    %78 = arith.select %74, %54, %29 : vector<8x32xi1>, vector<8x32xf32>
    %79 = arith.select %76, %72, %29 : vector<8x32xi1>, vector<8x32xf32>
    %80 = arith.select %76, %70, %29 : vector<8x32xi1>, vector<8x32xf32>
    %c1_i32 = arith.constant 1 : i32
    %81 = arith.index_cast %c1_i32 : i32 to index
    %c0_37 = arith.constant 0 : index
    %c0_38 = arith.constant 0 : index
    %82 = vector.load %arg9[%81, %c0_37, %c0_38] : memref<12x8x128xf32, #tpu.memory_space<vmem>>, vector<1x8x128xf32>
    %83 = vector.shape_cast %82 : vector<1x8x128xf32> to vector<8x128xf32>
    %cst_39 = arith.constant dense<0.000000e+00> : vector<8x128xf32>
    %84 = tpu.matmul %77, %21, %cst_39 {dimension_numbers = #tpu.dot_dimension_numbers<[1], [0], [0], [1], [0, 0, 1, 1], [], []>} : vector<8x32xf32>, vector<32x128xf32>, vector<8x128xf32> -> vector<8x128xf32>
    %85 = arith.addf %83, %84 : vector<8x128xf32>
    %c11_i32_40 = arith.constant 11 : i32
    %86 = arith.subi %c11_i32_40, %c1_i32 : i32
    %87 = arith.index_cast %86 : i32 to index
    %c0_41 = arith.constant 0 : index
    %c0_42 = arith.constant 0 : index
    %88 = vector.load %arg10[%87, %c0_41, %c0_42] : memref<12x8x128xf32, #tpu.memory_space<vmem>>, vector<1x8x128xf32>
    %89 = vector.shape_cast %88 : vector<1x8x128xf32> to vector<8x128xf32>
    %cst_43 = arith.constant dense<0.000000e+00> : vector<8x128xf32>
    %90 = tpu.matmul %79, %23, %cst_43 {dimension_numbers = #tpu.dot_dimension_numbers<[1], [0], [0], [1], [0, 0, 1, 1], [], []>} : vector<8x32xf32>, vector<32x128xf32>, vector<8x128xf32> -> vector<8x128xf32>
    %91 = arith.addf %89, %90 : vector<8x128xf32>
    %92 = vector.extract_strided_slice %85 {offsets = [0, 0], sizes = [8, 96], strides = [1, 1]} : vector<8x128xf32> to vector<8x96xf32>
    %93 = arith.negf %92 : vector<8x96xf32>
    %94 = math.exp %93 : vector<8x96xf32>
    %cst_44 = arith.constant 1.000000e+00 : f32
    %95 = vector.broadcast %cst_44 : f32 to vector<8x96xf32>
    %96 = arith.addf %95, %94 : vector<8x96xf32>
    %97 = arith.divf %95, %96 : vector<8x96xf32>
    %98 = vector.extract_strided_slice %85 {offsets = [0, 96], sizes = [8, 32], strides = [1, 1]} : vector<8x128xf32> to vector<8x32xf32>
    %99 = math.tanh %98 : vector<8x32xf32>
    %100 = vector.extract_strided_slice %97 {offsets = [0, 0], sizes = [8, 32], strides = [1, 1]} : vector<8x96xf32> to vector<8x32xf32>
    %101 = vector.extract_strided_slice %97 {offsets = [0, 32], sizes = [8, 32], strides = [1, 1]} : vector<8x96xf32> to vector<8x32xf32>
    %102 = vector.extract_strided_slice %97 {offsets = [0, 64], sizes = [8, 32], strides = [1, 1]} : vector<8x96xf32> to vector<8x32xf32>
    %103 = arith.mulf %101, %78 : vector<8x32xf32>
    %104 = arith.mulf %100, %99 : vector<8x32xf32>
    %105 = arith.addf %103, %104 : vector<8x32xf32>
    %106 = math.tanh %105 : vector<8x32xf32>
    %107 = arith.mulf %102, %106 : vector<8x32xf32>
    %108 = vector.extract_strided_slice %91 {offsets = [0, 0], sizes = [8, 96], strides = [1, 1]} : vector<8x128xf32> to vector<8x96xf32>
    %109 = arith.negf %108 : vector<8x96xf32>
    %110 = math.exp %109 : vector<8x96xf32>
    %cst_45 = arith.constant 1.000000e+00 : f32
    %111 = vector.broadcast %cst_45 : f32 to vector<8x96xf32>
    %112 = arith.addf %111, %110 : vector<8x96xf32>
    %113 = arith.divf %111, %112 : vector<8x96xf32>
    %114 = vector.extract_strided_slice %91 {offsets = [0, 96], sizes = [8, 32], strides = [1, 1]} : vector<8x128xf32> to vector<8x32xf32>
    %115 = math.tanh %114 : vector<8x32xf32>
    %116 = vector.extract_strided_slice %113 {offsets = [0, 0], sizes = [8, 32], strides = [1, 1]} : vector<8x96xf32> to vector<8x32xf32>
    %117 = vector.extract_strided_slice %113 {offsets = [0, 32], sizes = [8, 32], strides = [1, 1]} : vector<8x96xf32> to vector<8x32xf32>
    %118 = vector.extract_strided_slice %113 {offsets = [0, 64], sizes = [8, 32], strides = [1, 1]} : vector<8x96xf32> to vector<8x32xf32>
    %119 = arith.mulf %117, %80 : vector<8x32xf32>
    %120 = arith.mulf %116, %115 : vector<8x32xf32>
    %121 = arith.addf %119, %120 : vector<8x32xf32>
    %122 = math.tanh %121 : vector<8x32xf32>
    %123 = arith.mulf %118, %122 : vector<8x32xf32>
    %124 = vector.broadcast %c1_i32 : i32 to vector<8x32xi32>
    %125 = arith.cmpi slt, %124, %26 : vector<8x32xi32>
    %126 = vector.broadcast %c1_i32 : i32 to vector<8x32xi32>
    %127 = arith.cmpi sge, %126, %28 : vector<8x32xi32>
    %128 = arith.select %125, %107, %77 : vector<8x32xi1>, vector<8x32xf32>
    %129 = arith.select %125, %105, %78 : vector<8x32xi1>, vector<8x32xf32>
    %130 = arith.select %127, %123, %79 : vector<8x32xi1>, vector<8x32xf32>
    %131 = arith.select %127, %121, %80 : vector<8x32xi1>, vector<8x32xf32>
    %c2_i32 = arith.constant 2 : i32
    %132 = arith.index_cast %c2_i32 : i32 to index
    %c0_46 = arith.constant 0 : index
    %c0_47 = arith.constant 0 : index
    %133 = vector.load %arg9[%132, %c0_46, %c0_47] : memref<12x8x128xf32, #tpu.memory_space<vmem>>, vector<1x8x128xf32>
    %134 = vector.shape_cast %133 : vector<1x8x128xf32> to vector<8x128xf32>
    %cst_48 = arith.constant dense<0.000000e+00> : vector<8x128xf32>
    %135 = tpu.matmul %128, %21, %cst_48 {dimension_numbers = #tpu.dot_dimension_numbers<[1], [0], [0], [1], [0, 0, 1, 1], [], []>} : vector<8x32xf32>, vector<32x128xf32>, vector<8x128xf32> -> vector<8x128xf32>
    %136 = arith.addf %134, %135 : vector<8x128xf32>
    %c11_i32_49 = arith.constant 11 : i32
    %137 = arith.subi %c11_i32_49, %c2_i32 : i32
    %138 = arith.index_cast %137 : i32 to index
    %c0_50 = arith.constant 0 : index
    %c0_51 = arith.constant 0 : index
    %139 = vector.load %arg10[%138, %c0_50, %c0_51] : memref<12x8x128xf32, #tpu.memory_space<vmem>>, vector<1x8x128xf32>
    %140 = vector.shape_cast %139 : vector<1x8x128xf32> to vector<8x128xf32>
    %cst_52 = arith.constant dense<0.000000e+00> : vector<8x128xf32>
    %141 = tpu.matmul %130, %23, %cst_52 {dimension_numbers = #tpu.dot_dimension_numbers<[1], [0], [0], [1], [0, 0, 1, 1], [], []>} : vector<8x32xf32>, vector<32x128xf32>, vector<8x128xf32> -> vector<8x128xf32>
    %142 = arith.addf %140, %141 : vector<8x128xf32>
    %143 = vector.extract_strided_slice %136 {offsets = [0, 0], sizes = [8, 96], strides = [1, 1]} : vector<8x128xf32> to vector<8x96xf32>
    %144 = arith.negf %143 : vector<8x96xf32>
    %145 = math.exp %144 : vector<8x96xf32>
    %cst_53 = arith.constant 1.000000e+00 : f32
    %146 = vector.broadcast %cst_53 : f32 to vector<8x96xf32>
    %147 = arith.addf %146, %145 : vector<8x96xf32>
    %148 = arith.divf %146, %147 : vector<8x96xf32>
    %149 = vector.extract_strided_slice %136 {offsets = [0, 96], sizes = [8, 32], strides = [1, 1]} : vector<8x128xf32> to vector<8x32xf32>
    %150 = math.tanh %149 : vector<8x32xf32>
    %151 = vector.extract_strided_slice %148 {offsets = [0, 0], sizes = [8, 32], strides = [1, 1]} : vector<8x96xf32> to vector<8x32xf32>
    %152 = vector.extract_strided_slice %148 {offsets = [0, 32], sizes = [8, 32], strides = [1, 1]} : vector<8x96xf32> to vector<8x32xf32>
    %153 = vector.extract_strided_slice %148 {offsets = [0, 64], sizes = [8, 32], strides = [1, 1]} : vector<8x96xf32> to vector<8x32xf32>
    %154 = arith.mulf %152, %129 : vector<8x32xf32>
    %155 = arith.mulf %151, %150 : vector<8x32xf32>
    %156 = arith.addf %154, %155 : vector<8x32xf32>
    %157 = math.tanh %156 : vector<8x32xf32>
    %158 = arith.mulf %153, %157 : vector<8x32xf32>
    %159 = vector.extract_strided_slice %142 {offsets = [0, 0], sizes = [8, 96], strides = [1, 1]} : vector<8x128xf32> to vector<8x96xf32>
    %160 = arith.negf %159 : vector<8x96xf32>
    %161 = math.exp %160 : vector<8x96xf32>
    %cst_54 = arith.constant 1.000000e+00 : f32
    %162 = vector.broadcast %cst_54 : f32 to vector<8x96xf32>
    %163 = arith.addf %162, %161 : vector<8x96xf32>
    %164 = arith.divf %162, %163 : vector<8x96xf32>
    %165 = vector.extract_strided_slice %142 {offsets = [0, 96], sizes = [8, 32], strides = [1, 1]} : vector<8x128xf32> to vector<8x32xf32>
    %166 = math.tanh %165 : vector<8x32xf32>
    %167 = vector.extract_strided_slice %164 {offsets = [0, 0], sizes = [8, 32], strides = [1, 1]} : vector<8x96xf32> to vector<8x32xf32>
    %168 = vector.extract_strided_slice %164 {offsets = [0, 32], sizes = [8, 32], strides = [1, 1]} : vector<8x96xf32> to vector<8x32xf32>
    %169 = vector.extract_strided_slice %164 {offsets = [0, 64], sizes = [8, 32], strides = [1, 1]} : vector<8x96xf32> to vector<8x32xf32>
    %170 = arith.mulf %168, %131 : vector<8x32xf32>
    %171 = arith.mulf %167, %166 : vector<8x32xf32>
    %172 = arith.addf %170, %171 : vector<8x32xf32>
    %173 = math.tanh %172 : vector<8x32xf32>
    %174 = arith.mulf %169, %173 : vector<8x32xf32>
    %175 = vector.broadcast %c2_i32 : i32 to vector<8x32xi32>
    %176 = arith.cmpi slt, %175, %26 : vector<8x32xi32>
    %177 = vector.broadcast %c2_i32 : i32 to vector<8x32xi32>
    %178 = arith.cmpi sge, %177, %28 : vector<8x32xi32>
    %179 = arith.select %176, %158, %128 : vector<8x32xi1>, vector<8x32xf32>
    %180 = arith.select %176, %156, %129 : vector<8x32xi1>, vector<8x32xf32>
    %181 = arith.select %178, %174, %130 : vector<8x32xi1>, vector<8x32xf32>
    %182 = arith.select %178, %172, %131 : vector<8x32xi1>, vector<8x32xf32>
    %c3_i32 = arith.constant 3 : i32
    %183 = arith.index_cast %c3_i32 : i32 to index
    %c0_55 = arith.constant 0 : index
    %c0_56 = arith.constant 0 : index
    %184 = vector.load %arg9[%183, %c0_55, %c0_56] : memref<12x8x128xf32, #tpu.memory_space<vmem>>, vector<1x8x128xf32>
    %185 = vector.shape_cast %184 : vector<1x8x128xf32> to vector<8x128xf32>
    %cst_57 = arith.constant dense<0.000000e+00> : vector<8x128xf32>
    %186 = tpu.matmul %179, %21, %cst_57 {dimension_numbers = #tpu.dot_dimension_numbers<[1], [0], [0], [1], [0, 0, 1, 1], [], []>} : vector<8x32xf32>, vector<32x128xf32>, vector<8x128xf32> -> vector<8x128xf32>
    %187 = arith.addf %185, %186 : vector<8x128xf32>
    %c11_i32_58 = arith.constant 11 : i32
    %188 = arith.subi %c11_i32_58, %c3_i32 : i32
    %189 = arith.index_cast %188 : i32 to index
    %c0_59 = arith.constant 0 : index
    %c0_60 = arith.constant 0 : index
    %190 = vector.load %arg10[%189, %c0_59, %c0_60] : memref<12x8x128xf32, #tpu.memory_space<vmem>>, vector<1x8x128xf32>
    %191 = vector.shape_cast %190 : vector<1x8x128xf32> to vector<8x128xf32>
    %cst_61 = arith.constant dense<0.000000e+00> : vector<8x128xf32>
    %192 = tpu.matmul %181, %23, %cst_61 {dimension_numbers = #tpu.dot_dimension_numbers<[1], [0], [0], [1], [0, 0, 1, 1], [], []>} : vector<8x32xf32>, vector<32x128xf32>, vector<8x128xf32> -> vector<8x128xf32>
    %193 = arith.addf %191, %192 : vector<8x128xf32>
    %194 = vector.extract_strided_slice %187 {offsets = [0, 0], sizes = [8, 96], strides = [1, 1]} : vector<8x128xf32> to vector<8x96xf32>
    %195 = arith.negf %194 : vector<8x96xf32>
    %196 = math.exp %195 : vector<8x96xf32>
    %cst_62 = arith.constant 1.000000e+00 : f32
    %197 = vector.broadcast %cst_62 : f32 to vector<8x96xf32>
    %198 = arith.addf %197, %196 : vector<8x96xf32>
    %199 = arith.divf %197, %198 : vector<8x96xf32>
    %200 = vector.extract_strided_slice %187 {offsets = [0, 96], sizes = [8, 32], strides = [1, 1]} : vector<8x128xf32> to vector<8x32xf32>
    %201 = math.tanh %200 : vector<8x32xf32>
    %202 = vector.extract_strided_slice %199 {offsets = [0, 0], sizes = [8, 32], strides = [1, 1]} : vector<8x96xf32> to vector<8x32xf32>
    %203 = vector.extract_strided_slice %199 {offsets = [0, 32], sizes = [8, 32], strides = [1, 1]} : vector<8x96xf32> to vector<8x32xf32>
    %204 = vector.extract_strided_slice %199 {offsets = [0, 64], sizes = [8, 32], strides = [1, 1]} : vector<8x96xf32> to vector<8x32xf32>
    %205 = arith.mulf %203, %180 : vector<8x32xf32>
    %206 = arith.mulf %202, %201 : vector<8x32xf32>
    %207 = arith.addf %205, %206 : vector<8x32xf32>
    %208 = math.tanh %207 : vector<8x32xf32>
    %209 = arith.mulf %204, %208 : vector<8x32xf32>
    %210 = vector.extract_strided_slice %193 {offsets = [0, 0], sizes = [8, 96], strides = [1, 1]} : vector<8x128xf32> to vector<8x96xf32>
    %211 = arith.negf %210 : vector<8x96xf32>
    %212 = math.exp %211 : vector<8x96xf32>
    %cst_63 = arith.constant 1.000000e+00 : f32
    %213 = vector.broadcast %cst_63 : f32 to vector<8x96xf32>
    %214 = arith.addf %213, %212 : vector<8x96xf32>
    %215 = arith.divf %213, %214 : vector<8x96xf32>
    %216 = vector.extract_strided_slice %193 {offsets = [0, 96], sizes = [8, 32], strides = [1, 1]} : vector<8x128xf32> to vector<8x32xf32>
    %217 = math.tanh %216 : vector<8x32xf32>
    %218 = vector.extract_strided_slice %215 {offsets = [0, 0], sizes = [8, 32], strides = [1, 1]} : vector<8x96xf32> to vector<8x32xf32>
    %219 = vector.extract_strided_slice %215 {offsets = [0, 32], sizes = [8, 32], strides = [1, 1]} : vector<8x96xf32> to vector<8x32xf32>
    %220 = vector.extract_strided_slice %215 {offsets = [0, 64], sizes = [8, 32], strides = [1, 1]} : vector<8x96xf32> to vector<8x32xf32>
    %221 = arith.mulf %219, %182 : vector<8x32xf32>
    %222 = arith.mulf %218, %217 : vector<8x32xf32>
    %223 = arith.addf %221, %222 : vector<8x32xf32>
    %224 = math.tanh %223 : vector<8x32xf32>
    %225 = arith.mulf %220, %224 : vector<8x32xf32>
    %226 = vector.broadcast %c3_i32 : i32 to vector<8x32xi32>
    %227 = arith.cmpi slt, %226, %26 : vector<8x32xi32>
    %228 = vector.broadcast %c3_i32 : i32 to vector<8x32xi32>
    %229 = arith.cmpi sge, %228, %28 : vector<8x32xi32>
    %230 = arith.select %227, %209, %179 : vector<8x32xi1>, vector<8x32xf32>
    %231 = arith.select %227, %207, %180 : vector<8x32xi1>, vector<8x32xf32>
    %232 = arith.select %229, %225, %181 : vector<8x32xi1>, vector<8x32xf32>
    %233 = arith.select %229, %223, %182 : vector<8x32xi1>, vector<8x32xf32>
    %c4_i32 = arith.constant 4 : i32
    %234 = arith.index_cast %c4_i32 : i32 to index
    %c0_64 = arith.constant 0 : index
    %c0_65 = arith.constant 0 : index
    %235 = vector.load %arg9[%234, %c0_64, %c0_65] : memref<12x8x128xf32, #tpu.memory_space<vmem>>, vector<1x8x128xf32>
    %236 = vector.shape_cast %235 : vector<1x8x128xf32> to vector<8x128xf32>
    %cst_66 = arith.constant dense<0.000000e+00> : vector<8x128xf32>
    %237 = tpu.matmul %230, %21, %cst_66 {dimension_numbers = #tpu.dot_dimension_numbers<[1], [0], [0], [1], [0, 0, 1, 1], [], []>} : vector<8x32xf32>, vector<32x128xf32>, vector<8x128xf32> -> vector<8x128xf32>
    %238 = arith.addf %236, %237 : vector<8x128xf32>
    %c11_i32_67 = arith.constant 11 : i32
    %239 = arith.subi %c11_i32_67, %c4_i32 : i32
    %240 = arith.index_cast %239 : i32 to index
    %c0_68 = arith.constant 0 : index
    %c0_69 = arith.constant 0 : index
    %241 = vector.load %arg10[%240, %c0_68, %c0_69] : memref<12x8x128xf32, #tpu.memory_space<vmem>>, vector<1x8x128xf32>
    %242 = vector.shape_cast %241 : vector<1x8x128xf32> to vector<8x128xf32>
    %cst_70 = arith.constant dense<0.000000e+00> : vector<8x128xf32>
    %243 = tpu.matmul %232, %23, %cst_70 {dimension_numbers = #tpu.dot_dimension_numbers<[1], [0], [0], [1], [0, 0, 1, 1], [], []>} : vector<8x32xf32>, vector<32x128xf32>, vector<8x128xf32> -> vector<8x128xf32>
    %244 = arith.addf %242, %243 : vector<8x128xf32>
    %245 = vector.extract_strided_slice %238 {offsets = [0, 0], sizes = [8, 96], strides = [1, 1]} : vector<8x128xf32> to vector<8x96xf32>
    %246 = arith.negf %245 : vector<8x96xf32>
    %247 = math.exp %246 : vector<8x96xf32>
    %cst_71 = arith.constant 1.000000e+00 : f32
    %248 = vector.broadcast %cst_71 : f32 to vector<8x96xf32>
    %249 = arith.addf %248, %247 : vector<8x96xf32>
    %250 = arith.divf %248, %249 : vector<8x96xf32>
    %251 = vector.extract_strided_slice %238 {offsets = [0, 96], sizes = [8, 32], strides = [1, 1]} : vector<8x128xf32> to vector<8x32xf32>
    %252 = math.tanh %251 : vector<8x32xf32>
    %253 = vector.extract_strided_slice %250 {offsets = [0, 0], sizes = [8, 32], strides = [1, 1]} : vector<8x96xf32> to vector<8x32xf32>
    %254 = vector.extract_strided_slice %250 {offsets = [0, 32], sizes = [8, 32], strides = [1, 1]} : vector<8x96xf32> to vector<8x32xf32>
    %255 = vector.extract_strided_slice %250 {offsets = [0, 64], sizes = [8, 32], strides = [1, 1]} : vector<8x96xf32> to vector<8x32xf32>
    %256 = arith.mulf %254, %231 : vector<8x32xf32>
    %257 = arith.mulf %253, %252 : vector<8x32xf32>
    %258 = arith.addf %256, %257 : vector<8x32xf32>
    %259 = math.tanh %258 : vector<8x32xf32>
    %260 = arith.mulf %255, %259 : vector<8x32xf32>
    %261 = vector.extract_strided_slice %244 {offsets = [0, 0], sizes = [8, 96], strides = [1, 1]} : vector<8x128xf32> to vector<8x96xf32>
    %262 = arith.negf %261 : vector<8x96xf32>
    %263 = math.exp %262 : vector<8x96xf32>
    %cst_72 = arith.constant 1.000000e+00 : f32
    %264 = vector.broadcast %cst_72 : f32 to vector<8x96xf32>
    %265 = arith.addf %264, %263 : vector<8x96xf32>
    %266 = arith.divf %264, %265 : vector<8x96xf32>
    %267 = vector.extract_strided_slice %244 {offsets = [0, 96], sizes = [8, 32], strides = [1, 1]} : vector<8x128xf32> to vector<8x32xf32>
    %268 = math.tanh %267 : vector<8x32xf32>
    %269 = vector.extract_strided_slice %266 {offsets = [0, 0], sizes = [8, 32], strides = [1, 1]} : vector<8x96xf32> to vector<8x32xf32>
    %270 = vector.extract_strided_slice %266 {offsets = [0, 32], sizes = [8, 32], strides = [1, 1]} : vector<8x96xf32> to vector<8x32xf32>
    %271 = vector.extract_strided_slice %266 {offsets = [0, 64], sizes = [8, 32], strides = [1, 1]} : vector<8x96xf32> to vector<8x32xf32>
    %272 = arith.mulf %270, %233 : vector<8x32xf32>
    %273 = arith.mulf %269, %268 : vector<8x32xf32>
    %274 = arith.addf %272, %273 : vector<8x32xf32>
    %275 = math.tanh %274 : vector<8x32xf32>
    %276 = arith.mulf %271, %275 : vector<8x32xf32>
    %277 = vector.broadcast %c4_i32 : i32 to vector<8x32xi32>
    %278 = arith.cmpi slt, %277, %26 : vector<8x32xi32>
    %279 = vector.broadcast %c4_i32 : i32 to vector<8x32xi32>
    %280 = arith.cmpi sge, %279, %28 : vector<8x32xi32>
    %281 = arith.select %278, %260, %230 : vector<8x32xi1>, vector<8x32xf32>
    %282 = arith.select %278, %258, %231 : vector<8x32xi1>, vector<8x32xf32>
    %283 = arith.select %280, %276, %232 : vector<8x32xi1>, vector<8x32xf32>
    %284 = arith.select %280, %274, %233 : vector<8x32xi1>, vector<8x32xf32>
    %c5_i32 = arith.constant 5 : i32
    %285 = arith.index_cast %c5_i32 : i32 to index
    %c0_73 = arith.constant 0 : index
    %c0_74 = arith.constant 0 : index
    %286 = vector.load %arg9[%285, %c0_73, %c0_74] : memref<12x8x128xf32, #tpu.memory_space<vmem>>, vector<1x8x128xf32>
    %287 = vector.shape_cast %286 : vector<1x8x128xf32> to vector<8x128xf32>
    %cst_75 = arith.constant dense<0.000000e+00> : vector<8x128xf32>
    %288 = tpu.matmul %281, %21, %cst_75 {dimension_numbers = #tpu.dot_dimension_numbers<[1], [0], [0], [1], [0, 0, 1, 1], [], []>} : vector<8x32xf32>, vector<32x128xf32>, vector<8x128xf32> -> vector<8x128xf32>
    %289 = arith.addf %287, %288 : vector<8x128xf32>
    %c11_i32_76 = arith.constant 11 : i32
    %290 = arith.subi %c11_i32_76, %c5_i32 : i32
    %291 = arith.index_cast %290 : i32 to index
    %c0_77 = arith.constant 0 : index
    %c0_78 = arith.constant 0 : index
    %292 = vector.load %arg10[%291, %c0_77, %c0_78] : memref<12x8x128xf32, #tpu.memory_space<vmem>>, vector<1x8x128xf32>
    %293 = vector.shape_cast %292 : vector<1x8x128xf32> to vector<8x128xf32>
    %cst_79 = arith.constant dense<0.000000e+00> : vector<8x128xf32>
    %294 = tpu.matmul %283, %23, %cst_79 {dimension_numbers = #tpu.dot_dimension_numbers<[1], [0], [0], [1], [0, 0, 1, 1], [], []>} : vector<8x32xf32>, vector<32x128xf32>, vector<8x128xf32> -> vector<8x128xf32>
    %295 = arith.addf %293, %294 : vector<8x128xf32>
    %296 = vector.extract_strided_slice %289 {offsets = [0, 0], sizes = [8, 96], strides = [1, 1]} : vector<8x128xf32> to vector<8x96xf32>
    %297 = arith.negf %296 : vector<8x96xf32>
    %298 = math.exp %297 : vector<8x96xf32>
    %cst_80 = arith.constant 1.000000e+00 : f32
    %299 = vector.broadcast %cst_80 : f32 to vector<8x96xf32>
    %300 = arith.addf %299, %298 : vector<8x96xf32>
    %301 = arith.divf %299, %300 : vector<8x96xf32>
    %302 = vector.extract_strided_slice %289 {offsets = [0, 96], sizes = [8, 32], strides = [1, 1]} : vector<8x128xf32> to vector<8x32xf32>
    %303 = math.tanh %302 : vector<8x32xf32>
    %304 = vector.extract_strided_slice %301 {offsets = [0, 0], sizes = [8, 32], strides = [1, 1]} : vector<8x96xf32> to vector<8x32xf32>
    %305 = vector.extract_strided_slice %301 {offsets = [0, 32], sizes = [8, 32], strides = [1, 1]} : vector<8x96xf32> to vector<8x32xf32>
    %306 = vector.extract_strided_slice %301 {offsets = [0, 64], sizes = [8, 32], strides = [1, 1]} : vector<8x96xf32> to vector<8x32xf32>
    %307 = arith.mulf %305, %282 : vector<8x32xf32>
    %308 = arith.mulf %304, %303 : vector<8x32xf32>
    %309 = arith.addf %307, %308 : vector<8x32xf32>
    %310 = math.tanh %309 : vector<8x32xf32>
    %311 = arith.mulf %306, %310 : vector<8x32xf32>
    %312 = vector.extract_strided_slice %295 {offsets = [0, 0], sizes = [8, 96], strides = [1, 1]} : vector<8x128xf32> to vector<8x96xf32>
    %313 = arith.negf %312 : vector<8x96xf32>
    %314 = math.exp %313 : vector<8x96xf32>
    %cst_81 = arith.constant 1.000000e+00 : f32
    %315 = vector.broadcast %cst_81 : f32 to vector<8x96xf32>
    %316 = arith.addf %315, %314 : vector<8x96xf32>
    %317 = arith.divf %315, %316 : vector<8x96xf32>
    %318 = vector.extract_strided_slice %295 {offsets = [0, 96], sizes = [8, 32], strides = [1, 1]} : vector<8x128xf32> to vector<8x32xf32>
    %319 = math.tanh %318 : vector<8x32xf32>
    %320 = vector.extract_strided_slice %317 {offsets = [0, 0], sizes = [8, 32], strides = [1, 1]} : vector<8x96xf32> to vector<8x32xf32>
    %321 = vector.extract_strided_slice %317 {offsets = [0, 32], sizes = [8, 32], strides = [1, 1]} : vector<8x96xf32> to vector<8x32xf32>
    %322 = vector.extract_strided_slice %317 {offsets = [0, 64], sizes = [8, 32], strides = [1, 1]} : vector<8x96xf32> to vector<8x32xf32>
    %323 = arith.mulf %321, %284 : vector<8x32xf32>
    %324 = arith.mulf %320, %319 : vector<8x32xf32>
    %325 = arith.addf %323, %324 : vector<8x32xf32>
    %326 = math.tanh %325 : vector<8x32xf32>
    %327 = arith.mulf %322, %326 : vector<8x32xf32>
    %328 = vector.broadcast %c5_i32 : i32 to vector<8x32xi32>
    %329 = arith.cmpi slt, %328, %26 : vector<8x32xi32>
    %330 = vector.broadcast %c5_i32 : i32 to vector<8x32xi32>
    %331 = arith.cmpi sge, %330, %28 : vector<8x32xi32>
    %332 = arith.select %329, %311, %281 : vector<8x32xi1>, vector<8x32xf32>
    %333 = arith.select %329, %309, %282 : vector<8x32xi1>, vector<8x32xf32>
    %334 = arith.select %331, %327, %283 : vector<8x32xi1>, vector<8x32xf32>
    %335 = arith.select %331, %325, %284 : vector<8x32xi1>, vector<8x32xf32>
    %c6_i32 = arith.constant 6 : i32
    %336 = arith.index_cast %c6_i32 : i32 to index
    %c0_82 = arith.constant 0 : index
    %c0_83 = arith.constant 0 : index
    %337 = vector.load %arg9[%336, %c0_82, %c0_83] : memref<12x8x128xf32, #tpu.memory_space<vmem>>, vector<1x8x128xf32>
    %338 = vector.shape_cast %337 : vector<1x8x128xf32> to vector<8x128xf32>
    %cst_84 = arith.constant dense<0.000000e+00> : vector<8x128xf32>
    %339 = tpu.matmul %332, %21, %cst_84 {dimension_numbers = #tpu.dot_dimension_numbers<[1], [0], [0], [1], [0, 0, 1, 1], [], []>} : vector<8x32xf32>, vector<32x128xf32>, vector<8x128xf32> -> vector<8x128xf32>
    %340 = arith.addf %338, %339 : vector<8x128xf32>
    %c11_i32_85 = arith.constant 11 : i32
    %341 = arith.subi %c11_i32_85, %c6_i32 : i32
    %342 = arith.index_cast %341 : i32 to index
    %c0_86 = arith.constant 0 : index
    %c0_87 = arith.constant 0 : index
    %343 = vector.load %arg10[%342, %c0_86, %c0_87] : memref<12x8x128xf32, #tpu.memory_space<vmem>>, vector<1x8x128xf32>
    %344 = vector.shape_cast %343 : vector<1x8x128xf32> to vector<8x128xf32>
    %cst_88 = arith.constant dense<0.000000e+00> : vector<8x128xf32>
    %345 = tpu.matmul %334, %23, %cst_88 {dimension_numbers = #tpu.dot_dimension_numbers<[1], [0], [0], [1], [0, 0, 1, 1], [], []>} : vector<8x32xf32>, vector<32x128xf32>, vector<8x128xf32> -> vector<8x128xf32>
    %346 = arith.addf %344, %345 : vector<8x128xf32>
    %347 = vector.extract_strided_slice %340 {offsets = [0, 0], sizes = [8, 96], strides = [1, 1]} : vector<8x128xf32> to vector<8x96xf32>
    %348 = arith.negf %347 : vector<8x96xf32>
    %349 = math.exp %348 : vector<8x96xf32>
    %cst_89 = arith.constant 1.000000e+00 : f32
    %350 = vector.broadcast %cst_89 : f32 to vector<8x96xf32>
    %351 = arith.addf %350, %349 : vector<8x96xf32>
    %352 = arith.divf %350, %351 : vector<8x96xf32>
    %353 = vector.extract_strided_slice %340 {offsets = [0, 96], sizes = [8, 32], strides = [1, 1]} : vector<8x128xf32> to vector<8x32xf32>
    %354 = math.tanh %353 : vector<8x32xf32>
    %355 = vector.extract_strided_slice %352 {offsets = [0, 0], sizes = [8, 32], strides = [1, 1]} : vector<8x96xf32> to vector<8x32xf32>
    %356 = vector.extract_strided_slice %352 {offsets = [0, 32], sizes = [8, 32], strides = [1, 1]} : vector<8x96xf32> to vector<8x32xf32>
    %357 = vector.extract_strided_slice %352 {offsets = [0, 64], sizes = [8, 32], strides = [1, 1]} : vector<8x96xf32> to vector<8x32xf32>
    %358 = arith.mulf %356, %333 : vector<8x32xf32>
    %359 = arith.mulf %355, %354 : vector<8x32xf32>
    %360 = arith.addf %358, %359 : vector<8x32xf32>
    %361 = math.tanh %360 : vector<8x32xf32>
    %362 = arith.mulf %357, %361 : vector<8x32xf32>
    %363 = vector.extract_strided_slice %346 {offsets = [0, 0], sizes = [8, 96], strides = [1, 1]} : vector<8x128xf32> to vector<8x96xf32>
    %364 = arith.negf %363 : vector<8x96xf32>
    %365 = math.exp %364 : vector<8x96xf32>
    %cst_90 = arith.constant 1.000000e+00 : f32
    %366 = vector.broadcast %cst_90 : f32 to vector<8x96xf32>
    %367 = arith.addf %366, %365 : vector<8x96xf32>
    %368 = arith.divf %366, %367 : vector<8x96xf32>
    %369 = vector.extract_strided_slice %346 {offsets = [0, 96], sizes = [8, 32], strides = [1, 1]} : vector<8x128xf32> to vector<8x32xf32>
    %370 = math.tanh %369 : vector<8x32xf32>
    %371 = vector.extract_strided_slice %368 {offsets = [0, 0], sizes = [8, 32], strides = [1, 1]} : vector<8x96xf32> to vector<8x32xf32>
    %372 = vector.extract_strided_slice %368 {offsets = [0, 32], sizes = [8, 32], strides = [1, 1]} : vector<8x96xf32> to vector<8x32xf32>
    %373 = vector.extract_strided_slice %368 {offsets = [0, 64], sizes = [8, 32], strides = [1, 1]} : vector<8x96xf32> to vector<8x32xf32>
    %374 = arith.mulf %372, %335 : vector<8x32xf32>
    %375 = arith.mulf %371, %370 : vector<8x32xf32>
    %376 = arith.addf %374, %375 : vector<8x32xf32>
    %377 = math.tanh %376 : vector<8x32xf32>
    %378 = arith.mulf %373, %377 : vector<8x32xf32>
    %379 = vector.broadcast %c6_i32 : i32 to vector<8x32xi32>
    %380 = arith.cmpi slt, %379, %26 : vector<8x32xi32>
    %381 = vector.broadcast %c6_i32 : i32 to vector<8x32xi32>
    %382 = arith.cmpi sge, %381, %28 : vector<8x32xi32>
    %383 = arith.select %380, %362, %332 : vector<8x32xi1>, vector<8x32xf32>
    %384 = arith.select %380, %360, %333 : vector<8x32xi1>, vector<8x32xf32>
    %385 = arith.select %382, %378, %334 : vector<8x32xi1>, vector<8x32xf32>
    %386 = arith.select %382, %376, %335 : vector<8x32xi1>, vector<8x32xf32>
    %c7_i32 = arith.constant 7 : i32
    %387 = arith.index_cast %c7_i32 : i32 to index
    %c0_91 = arith.constant 0 : index
    %c0_92 = arith.constant 0 : index
    %388 = vector.load %arg9[%387, %c0_91, %c0_92] : memref<12x8x128xf32, #tpu.memory_space<vmem>>, vector<1x8x128xf32>
    %389 = vector.shape_cast %388 : vector<1x8x128xf32> to vector<8x128xf32>
    %cst_93 = arith.constant dense<0.000000e+00> : vector<8x128xf32>
    %390 = tpu.matmul %383, %21, %cst_93 {dimension_numbers = #tpu.dot_dimension_numbers<[1], [0], [0], [1], [0, 0, 1, 1], [], []>} : vector<8x32xf32>, vector<32x128xf32>, vector<8x128xf32> -> vector<8x128xf32>
    %391 = arith.addf %389, %390 : vector<8x128xf32>
    %c11_i32_94 = arith.constant 11 : i32
    %392 = arith.subi %c11_i32_94, %c7_i32 : i32
    %393 = arith.index_cast %392 : i32 to index
    %c0_95 = arith.constant 0 : index
    %c0_96 = arith.constant 0 : index
    %394 = vector.load %arg10[%393, %c0_95, %c0_96] : memref<12x8x128xf32, #tpu.memory_space<vmem>>, vector<1x8x128xf32>
    %395 = vector.shape_cast %394 : vector<1x8x128xf32> to vector<8x128xf32>
    %cst_97 = arith.constant dense<0.000000e+00> : vector<8x128xf32>
    %396 = tpu.matmul %385, %23, %cst_97 {dimension_numbers = #tpu.dot_dimension_numbers<[1], [0], [0], [1], [0, 0, 1, 1], [], []>} : vector<8x32xf32>, vector<32x128xf32>, vector<8x128xf32> -> vector<8x128xf32>
    %397 = arith.addf %395, %396 : vector<8x128xf32>
    %398 = vector.extract_strided_slice %391 {offsets = [0, 0], sizes = [8, 96], strides = [1, 1]} : vector<8x128xf32> to vector<8x96xf32>
    %399 = arith.negf %398 : vector<8x96xf32>
    %400 = math.exp %399 : vector<8x96xf32>
    %cst_98 = arith.constant 1.000000e+00 : f32
    %401 = vector.broadcast %cst_98 : f32 to vector<8x96xf32>
    %402 = arith.addf %401, %400 : vector<8x96xf32>
    %403 = arith.divf %401, %402 : vector<8x96xf32>
    %404 = vector.extract_strided_slice %391 {offsets = [0, 96], sizes = [8, 32], strides = [1, 1]} : vector<8x128xf32> to vector<8x32xf32>
    %405 = math.tanh %404 : vector<8x32xf32>
    %406 = vector.extract_strided_slice %403 {offsets = [0, 0], sizes = [8, 32], strides = [1, 1]} : vector<8x96xf32> to vector<8x32xf32>
    %407 = vector.extract_strided_slice %403 {offsets = [0, 32], sizes = [8, 32], strides = [1, 1]} : vector<8x96xf32> to vector<8x32xf32>
    %408 = vector.extract_strided_slice %403 {offsets = [0, 64], sizes = [8, 32], strides = [1, 1]} : vector<8x96xf32> to vector<8x32xf32>
    %409 = arith.mulf %407, %384 : vector<8x32xf32>
    %410 = arith.mulf %406, %405 : vector<8x32xf32>
    %411 = arith.addf %409, %410 : vector<8x32xf32>
    %412 = math.tanh %411 : vector<8x32xf32>
    %413 = arith.mulf %408, %412 : vector<8x32xf32>
    %414 = vector.extract_strided_slice %397 {offsets = [0, 0], sizes = [8, 96], strides = [1, 1]} : vector<8x128xf32> to vector<8x96xf32>
    %415 = arith.negf %414 : vector<8x96xf32>
    %416 = math.exp %415 : vector<8x96xf32>
    %cst_99 = arith.constant 1.000000e+00 : f32
    %417 = vector.broadcast %cst_99 : f32 to vector<8x96xf32>
    %418 = arith.addf %417, %416 : vector<8x96xf32>
    %419 = arith.divf %417, %418 : vector<8x96xf32>
    %420 = vector.extract_strided_slice %397 {offsets = [0, 96], sizes = [8, 32], strides = [1, 1]} : vector<8x128xf32> to vector<8x32xf32>
    %421 = math.tanh %420 : vector<8x32xf32>
    %422 = vector.extract_strided_slice %419 {offsets = [0, 0], sizes = [8, 32], strides = [1, 1]} : vector<8x96xf32> to vector<8x32xf32>
    %423 = vector.extract_strided_slice %419 {offsets = [0, 32], sizes = [8, 32], strides = [1, 1]} : vector<8x96xf32> to vector<8x32xf32>
    %424 = vector.extract_strided_slice %419 {offsets = [0, 64], sizes = [8, 32], strides = [1, 1]} : vector<8x96xf32> to vector<8x32xf32>
    %425 = arith.mulf %423, %386 : vector<8x32xf32>
    %426 = arith.mulf %422, %421 : vector<8x32xf32>
    %427 = arith.addf %425, %426 : vector<8x32xf32>
    %428 = math.tanh %427 : vector<8x32xf32>
    %429 = arith.mulf %424, %428 : vector<8x32xf32>
    %430 = vector.broadcast %c7_i32 : i32 to vector<8x32xi32>
    %431 = arith.cmpi slt, %430, %26 : vector<8x32xi32>
    %432 = vector.broadcast %c7_i32 : i32 to vector<8x32xi32>
    %433 = arith.cmpi sge, %432, %28 : vector<8x32xi32>
    %434 = arith.select %431, %413, %383 : vector<8x32xi1>, vector<8x32xf32>
    %435 = arith.select %431, %411, %384 : vector<8x32xi1>, vector<8x32xf32>
    %436 = arith.select %433, %429, %385 : vector<8x32xi1>, vector<8x32xf32>
    %437 = arith.select %433, %427, %386 : vector<8x32xi1>, vector<8x32xf32>
    %c8_i32 = arith.constant 8 : i32
    %438 = arith.index_cast %c8_i32 : i32 to index
    %c0_100 = arith.constant 0 : index
    %c0_101 = arith.constant 0 : index
    %439 = vector.load %arg9[%438, %c0_100, %c0_101] : memref<12x8x128xf32, #tpu.memory_space<vmem>>, vector<1x8x128xf32>
    %440 = vector.shape_cast %439 : vector<1x8x128xf32> to vector<8x128xf32>
    %cst_102 = arith.constant dense<0.000000e+00> : vector<8x128xf32>
    %441 = tpu.matmul %434, %21, %cst_102 {dimension_numbers = #tpu.dot_dimension_numbers<[1], [0], [0], [1], [0, 0, 1, 1], [], []>} : vector<8x32xf32>, vector<32x128xf32>, vector<8x128xf32> -> vector<8x128xf32>
    %442 = arith.addf %440, %441 : vector<8x128xf32>
    %c11_i32_103 = arith.constant 11 : i32
    %443 = arith.subi %c11_i32_103, %c8_i32 : i32
    %444 = arith.index_cast %443 : i32 to index
    %c0_104 = arith.constant 0 : index
    %c0_105 = arith.constant 0 : index
    %445 = vector.load %arg10[%444, %c0_104, %c0_105] : memref<12x8x128xf32, #tpu.memory_space<vmem>>, vector<1x8x128xf32>
    %446 = vector.shape_cast %445 : vector<1x8x128xf32> to vector<8x128xf32>
    %cst_106 = arith.constant dense<0.000000e+00> : vector<8x128xf32>
    %447 = tpu.matmul %436, %23, %cst_106 {dimension_numbers = #tpu.dot_dimension_numbers<[1], [0], [0], [1], [0, 0, 1, 1], [], []>} : vector<8x32xf32>, vector<32x128xf32>, vector<8x128xf32> -> vector<8x128xf32>
    %448 = arith.addf %446, %447 : vector<8x128xf32>
    %449 = vector.extract_strided_slice %442 {offsets = [0, 0], sizes = [8, 96], strides = [1, 1]} : vector<8x128xf32> to vector<8x96xf32>
    %450 = arith.negf %449 : vector<8x96xf32>
    %451 = math.exp %450 : vector<8x96xf32>
    %cst_107 = arith.constant 1.000000e+00 : f32
    %452 = vector.broadcast %cst_107 : f32 to vector<8x96xf32>
    %453 = arith.addf %452, %451 : vector<8x96xf32>
    %454 = arith.divf %452, %453 : vector<8x96xf32>
    %455 = vector.extract_strided_slice %442 {offsets = [0, 96], sizes = [8, 32], strides = [1, 1]} : vector<8x128xf32> to vector<8x32xf32>
    %456 = math.tanh %455 : vector<8x32xf32>
    %457 = vector.extract_strided_slice %454 {offsets = [0, 0], sizes = [8, 32], strides = [1, 1]} : vector<8x96xf32> to vector<8x32xf32>
    %458 = vector.extract_strided_slice %454 {offsets = [0, 32], sizes = [8, 32], strides = [1, 1]} : vector<8x96xf32> to vector<8x32xf32>
    %459 = vector.extract_strided_slice %454 {offsets = [0, 64], sizes = [8, 32], strides = [1, 1]} : vector<8x96xf32> to vector<8x32xf32>
    %460 = arith.mulf %458, %435 : vector<8x32xf32>
    %461 = arith.mulf %457, %456 : vector<8x32xf32>
    %462 = arith.addf %460, %461 : vector<8x32xf32>
    %463 = math.tanh %462 : vector<8x32xf32>
    %464 = arith.mulf %459, %463 : vector<8x32xf32>
    %465 = vector.extract_strided_slice %448 {offsets = [0, 0], sizes = [8, 96], strides = [1, 1]} : vector<8x128xf32> to vector<8x96xf32>
    %466 = arith.negf %465 : vector<8x96xf32>
    %467 = math.exp %466 : vector<8x96xf32>
    %cst_108 = arith.constant 1.000000e+00 : f32
    %468 = vector.broadcast %cst_108 : f32 to vector<8x96xf32>
    %469 = arith.addf %468, %467 : vector<8x96xf32>
    %470 = arith.divf %468, %469 : vector<8x96xf32>
    %471 = vector.extract_strided_slice %448 {offsets = [0, 96], sizes = [8, 32], strides = [1, 1]} : vector<8x128xf32> to vector<8x32xf32>
    %472 = math.tanh %471 : vector<8x32xf32>
    %473 = vector.extract_strided_slice %470 {offsets = [0, 0], sizes = [8, 32], strides = [1, 1]} : vector<8x96xf32> to vector<8x32xf32>
    %474 = vector.extract_strided_slice %470 {offsets = [0, 32], sizes = [8, 32], strides = [1, 1]} : vector<8x96xf32> to vector<8x32xf32>
    %475 = vector.extract_strided_slice %470 {offsets = [0, 64], sizes = [8, 32], strides = [1, 1]} : vector<8x96xf32> to vector<8x32xf32>
    %476 = arith.mulf %474, %437 : vector<8x32xf32>
    %477 = arith.mulf %473, %472 : vector<8x32xf32>
    %478 = arith.addf %476, %477 : vector<8x32xf32>
    %479 = math.tanh %478 : vector<8x32xf32>
    %480 = arith.mulf %475, %479 : vector<8x32xf32>
    %481 = vector.broadcast %c8_i32 : i32 to vector<8x32xi32>
    %482 = arith.cmpi slt, %481, %26 : vector<8x32xi32>
    %483 = vector.broadcast %c8_i32 : i32 to vector<8x32xi32>
    %484 = arith.cmpi sge, %483, %28 : vector<8x32xi32>
    %485 = arith.select %482, %464, %434 : vector<8x32xi1>, vector<8x32xf32>
    %486 = arith.select %482, %462, %435 : vector<8x32xi1>, vector<8x32xf32>
    %487 = arith.select %484, %480, %436 : vector<8x32xi1>, vector<8x32xf32>
    %488 = arith.select %484, %478, %437 : vector<8x32xi1>, vector<8x32xf32>
    %c9_i32 = arith.constant 9 : i32
    %489 = arith.index_cast %c9_i32 : i32 to index
    %c0_109 = arith.constant 0 : index
    %c0_110 = arith.constant 0 : index
    %490 = vector.load %arg9[%489, %c0_109, %c0_110] : memref<12x8x128xf32, #tpu.memory_space<vmem>>, vector<1x8x128xf32>
    %491 = vector.shape_cast %490 : vector<1x8x128xf32> to vector<8x128xf32>
    %cst_111 = arith.constant dense<0.000000e+00> : vector<8x128xf32>
    %492 = tpu.matmul %485, %21, %cst_111 {dimension_numbers = #tpu.dot_dimension_numbers<[1], [0], [0], [1], [0, 0, 1, 1], [], []>} : vector<8x32xf32>, vector<32x128xf32>, vector<8x128xf32> -> vector<8x128xf32>
    %493 = arith.addf %491, %492 : vector<8x128xf32>
    %c11_i32_112 = arith.constant 11 : i32
    %494 = arith.subi %c11_i32_112, %c9_i32 : i32
    %495 = arith.index_cast %494 : i32 to index
    %c0_113 = arith.constant 0 : index
    %c0_114 = arith.constant 0 : index
    %496 = vector.load %arg10[%495, %c0_113, %c0_114] : memref<12x8x128xf32, #tpu.memory_space<vmem>>, vector<1x8x128xf32>
    %497 = vector.shape_cast %496 : vector<1x8x128xf32> to vector<8x128xf32>
    %cst_115 = arith.constant dense<0.000000e+00> : vector<8x128xf32>
    %498 = tpu.matmul %487, %23, %cst_115 {dimension_numbers = #tpu.dot_dimension_numbers<[1], [0], [0], [1], [0, 0, 1, 1], [], []>} : vector<8x32xf32>, vector<32x128xf32>, vector<8x128xf32> -> vector<8x128xf32>
    %499 = arith.addf %497, %498 : vector<8x128xf32>
    %500 = vector.extract_strided_slice %493 {offsets = [0, 0], sizes = [8, 96], strides = [1, 1]} : vector<8x128xf32> to vector<8x96xf32>
    %501 = arith.negf %500 : vector<8x96xf32>
    %502 = math.exp %501 : vector<8x96xf32>
    %cst_116 = arith.constant 1.000000e+00 : f32
    %503 = vector.broadcast %cst_116 : f32 to vector<8x96xf32>
    %504 = arith.addf %503, %502 : vector<8x96xf32>
    %505 = arith.divf %503, %504 : vector<8x96xf32>
    %506 = vector.extract_strided_slice %493 {offsets = [0, 96], sizes = [8, 32], strides = [1, 1]} : vector<8x128xf32> to vector<8x32xf32>
    %507 = math.tanh %506 : vector<8x32xf32>
    %508 = vector.extract_strided_slice %505 {offsets = [0, 0], sizes = [8, 32], strides = [1, 1]} : vector<8x96xf32> to vector<8x32xf32>
    %509 = vector.extract_strided_slice %505 {offsets = [0, 32], sizes = [8, 32], strides = [1, 1]} : vector<8x96xf32> to vector<8x32xf32>
    %510 = vector.extract_strided_slice %505 {offsets = [0, 64], sizes = [8, 32], strides = [1, 1]} : vector<8x96xf32> to vector<8x32xf32>
    %511 = arith.mulf %509, %486 : vector<8x32xf32>
    %512 = arith.mulf %508, %507 : vector<8x32xf32>
    %513 = arith.addf %511, %512 : vector<8x32xf32>
    %514 = math.tanh %513 : vector<8x32xf32>
    %515 = arith.mulf %510, %514 : vector<8x32xf32>
    %516 = vector.extract_strided_slice %499 {offsets = [0, 0], sizes = [8, 96], strides = [1, 1]} : vector<8x128xf32> to vector<8x96xf32>
    %517 = arith.negf %516 : vector<8x96xf32>
    %518 = math.exp %517 : vector<8x96xf32>
    %cst_117 = arith.constant 1.000000e+00 : f32
    %519 = vector.broadcast %cst_117 : f32 to vector<8x96xf32>
    %520 = arith.addf %519, %518 : vector<8x96xf32>
    %521 = arith.divf %519, %520 : vector<8x96xf32>
    %522 = vector.extract_strided_slice %499 {offsets = [0, 96], sizes = [8, 32], strides = [1, 1]} : vector<8x128xf32> to vector<8x32xf32>
    %523 = math.tanh %522 : vector<8x32xf32>
    %524 = vector.extract_strided_slice %521 {offsets = [0, 0], sizes = [8, 32], strides = [1, 1]} : vector<8x96xf32> to vector<8x32xf32>
    %525 = vector.extract_strided_slice %521 {offsets = [0, 32], sizes = [8, 32], strides = [1, 1]} : vector<8x96xf32> to vector<8x32xf32>
    %526 = vector.extract_strided_slice %521 {offsets = [0, 64], sizes = [8, 32], strides = [1, 1]} : vector<8x96xf32> to vector<8x32xf32>
    %527 = arith.mulf %525, %488 : vector<8x32xf32>
    %528 = arith.mulf %524, %523 : vector<8x32xf32>
    %529 = arith.addf %527, %528 : vector<8x32xf32>
    %530 = math.tanh %529 : vector<8x32xf32>
    %531 = arith.mulf %526, %530 : vector<8x32xf32>
    %532 = vector.broadcast %c9_i32 : i32 to vector<8x32xi32>
    %533 = arith.cmpi slt, %532, %26 : vector<8x32xi32>
    %534 = vector.broadcast %c9_i32 : i32 to vector<8x32xi32>
    %535 = arith.cmpi sge, %534, %28 : vector<8x32xi32>
    %536 = arith.select %533, %515, %485 : vector<8x32xi1>, vector<8x32xf32>
    %537 = arith.select %533, %513, %486 : vector<8x32xi1>, vector<8x32xf32>
    %538 = arith.select %535, %531, %487 : vector<8x32xi1>, vector<8x32xf32>
    %539 = arith.select %535, %529, %488 : vector<8x32xi1>, vector<8x32xf32>
    %c10_i32 = arith.constant 10 : i32
    %540 = arith.index_cast %c10_i32 : i32 to index
    %c0_118 = arith.constant 0 : index
    %c0_119 = arith.constant 0 : index
    %541 = vector.load %arg9[%540, %c0_118, %c0_119] : memref<12x8x128xf32, #tpu.memory_space<vmem>>, vector<1x8x128xf32>
    %542 = vector.shape_cast %541 : vector<1x8x128xf32> to vector<8x128xf32>
    %cst_120 = arith.constant dense<0.000000e+00> : vector<8x128xf32>
    %543 = tpu.matmul %536, %21, %cst_120 {dimension_numbers = #tpu.dot_dimension_numbers<[1], [0], [0], [1], [0, 0, 1, 1], [], []>} : vector<8x32xf32>, vector<32x128xf32>, vector<8x128xf32> -> vector<8x128xf32>
    %544 = arith.addf %542, %543 : vector<8x128xf32>
    %c11_i32_121 = arith.constant 11 : i32
    %545 = arith.subi %c11_i32_121, %c10_i32 : i32
    %546 = arith.index_cast %545 : i32 to index
    %c0_122 = arith.constant 0 : index
    %c0_123 = arith.constant 0 : index
    %547 = vector.load %arg10[%546, %c0_122, %c0_123] : memref<12x8x128xf32, #tpu.memory_space<vmem>>, vector<1x8x128xf32>
    %548 = vector.shape_cast %547 : vector<1x8x128xf32> to vector<8x128xf32>
    %cst_124 = arith.constant dense<0.000000e+00> : vector<8x128xf32>
    %549 = tpu.matmul %538, %23, %cst_124 {dimension_numbers = #tpu.dot_dimension_numbers<[1], [0], [0], [1], [0, 0, 1, 1], [], []>} : vector<8x32xf32>, vector<32x128xf32>, vector<8x128xf32> -> vector<8x128xf32>
    %550 = arith.addf %548, %549 : vector<8x128xf32>
    %551 = vector.extract_strided_slice %544 {offsets = [0, 0], sizes = [8, 96], strides = [1, 1]} : vector<8x128xf32> to vector<8x96xf32>
    %552 = arith.negf %551 : vector<8x96xf32>
    %553 = math.exp %552 : vector<8x96xf32>
    %cst_125 = arith.constant 1.000000e+00 : f32
    %554 = vector.broadcast %cst_125 : f32 to vector<8x96xf32>
    %555 = arith.addf %554, %553 : vector<8x96xf32>
    %556 = arith.divf %554, %555 : vector<8x96xf32>
    %557 = vector.extract_strided_slice %544 {offsets = [0, 96], sizes = [8, 32], strides = [1, 1]} : vector<8x128xf32> to vector<8x32xf32>
    %558 = math.tanh %557 : vector<8x32xf32>
    %559 = vector.extract_strided_slice %556 {offsets = [0, 0], sizes = [8, 32], strides = [1, 1]} : vector<8x96xf32> to vector<8x32xf32>
    %560 = vector.extract_strided_slice %556 {offsets = [0, 32], sizes = [8, 32], strides = [1, 1]} : vector<8x96xf32> to vector<8x32xf32>
    %561 = vector.extract_strided_slice %556 {offsets = [0, 64], sizes = [8, 32], strides = [1, 1]} : vector<8x96xf32> to vector<8x32xf32>
    %562 = arith.mulf %560, %537 : vector<8x32xf32>
    %563 = arith.mulf %559, %558 : vector<8x32xf32>
    %564 = arith.addf %562, %563 : vector<8x32xf32>
    %565 = math.tanh %564 : vector<8x32xf32>
    %566 = arith.mulf %561, %565 : vector<8x32xf32>
    %567 = vector.extract_strided_slice %550 {offsets = [0, 0], sizes = [8, 96], strides = [1, 1]} : vector<8x128xf32> to vector<8x96xf32>
    %568 = arith.negf %567 : vector<8x96xf32>
    %569 = math.exp %568 : vector<8x96xf32>
    %cst_126 = arith.constant 1.000000e+00 : f32
    %570 = vector.broadcast %cst_126 : f32 to vector<8x96xf32>
    %571 = arith.addf %570, %569 : vector<8x96xf32>
    %572 = arith.divf %570, %571 : vector<8x96xf32>
    %573 = vector.extract_strided_slice %550 {offsets = [0, 96], sizes = [8, 32], strides = [1, 1]} : vector<8x128xf32> to vector<8x32xf32>
    %574 = math.tanh %573 : vector<8x32xf32>
    %575 = vector.extract_strided_slice %572 {offsets = [0, 0], sizes = [8, 32], strides = [1, 1]} : vector<8x96xf32> to vector<8x32xf32>
    %576 = vector.extract_strided_slice %572 {offsets = [0, 32], sizes = [8, 32], strides = [1, 1]} : vector<8x96xf32> to vector<8x32xf32>
    %577 = vector.extract_strided_slice %572 {offsets = [0, 64], sizes = [8, 32], strides = [1, 1]} : vector<8x96xf32> to vector<8x32xf32>
    %578 = arith.mulf %576, %539 : vector<8x32xf32>
    %579 = arith.mulf %575, %574 : vector<8x32xf32>
    %580 = arith.addf %578, %579 : vector<8x32xf32>
    %581 = math.tanh %580 : vector<8x32xf32>
    %582 = arith.mulf %577, %581 : vector<8x32xf32>
    %583 = vector.broadcast %c10_i32 : i32 to vector<8x32xi32>
    %584 = arith.cmpi slt, %583, %26 : vector<8x32xi32>
    %585 = vector.broadcast %c10_i32 : i32 to vector<8x32xi32>
    %586 = arith.cmpi sge, %585, %28 : vector<8x32xi32>
    %587 = arith.select %584, %566, %536 : vector<8x32xi1>, vector<8x32xf32>
    %588 = arith.select %584, %564, %537 : vector<8x32xi1>, vector<8x32xf32>
    %589 = arith.select %586, %582, %538 : vector<8x32xi1>, vector<8x32xf32>
    %590 = arith.select %586, %580, %539 : vector<8x32xi1>, vector<8x32xf32>
    %c11_i32_127 = arith.constant 11 : i32
    %591 = arith.index_cast %c11_i32_127 : i32 to index
    %c0_128 = arith.constant 0 : index
    %c0_129 = arith.constant 0 : index
    %592 = vector.load %arg9[%591, %c0_128, %c0_129] : memref<12x8x128xf32, #tpu.memory_space<vmem>>, vector<1x8x128xf32>
    %593 = vector.shape_cast %592 : vector<1x8x128xf32> to vector<8x128xf32>
    %cst_130 = arith.constant dense<0.000000e+00> : vector<8x128xf32>
    %594 = tpu.matmul %587, %21, %cst_130 {dimension_numbers = #tpu.dot_dimension_numbers<[1], [0], [0], [1], [0, 0, 1, 1], [], []>} : vector<8x32xf32>, vector<32x128xf32>, vector<8x128xf32> -> vector<8x128xf32>
    %595 = arith.addf %593, %594 : vector<8x128xf32>
    %c11_i32_131 = arith.constant 11 : i32
    %596 = arith.subi %c11_i32_131, %c11_i32_127 : i32
    %597 = arith.index_cast %596 : i32 to index
    %c0_132 = arith.constant 0 : index
    %c0_133 = arith.constant 0 : index
    %598 = vector.load %arg10[%597, %c0_132, %c0_133] : memref<12x8x128xf32, #tpu.memory_space<vmem>>, vector<1x8x128xf32>
    %599 = vector.shape_cast %598 : vector<1x8x128xf32> to vector<8x128xf32>
    %cst_134 = arith.constant dense<0.000000e+00> : vector<8x128xf32>
    %600 = tpu.matmul %589, %23, %cst_134 {dimension_numbers = #tpu.dot_dimension_numbers<[1], [0], [0], [1], [0, 0, 1, 1], [], []>} : vector<8x32xf32>, vector<32x128xf32>, vector<8x128xf32> -> vector<8x128xf32>
    %601 = arith.addf %599, %600 : vector<8x128xf32>
    %602 = vector.extract_strided_slice %595 {offsets = [0, 0], sizes = [8, 96], strides = [1, 1]} : vector<8x128xf32> to vector<8x96xf32>
    %603 = arith.negf %602 : vector<8x96xf32>
    %604 = math.exp %603 : vector<8x96xf32>
    %cst_135 = arith.constant 1.000000e+00 : f32
    %605 = vector.broadcast %cst_135 : f32 to vector<8x96xf32>
    %606 = arith.addf %605, %604 : vector<8x96xf32>
    %607 = arith.divf %605, %606 : vector<8x96xf32>
    %608 = vector.extract_strided_slice %595 {offsets = [0, 96], sizes = [8, 32], strides = [1, 1]} : vector<8x128xf32> to vector<8x32xf32>
    %609 = math.tanh %608 : vector<8x32xf32>
    %610 = vector.extract_strided_slice %607 {offsets = [0, 0], sizes = [8, 32], strides = [1, 1]} : vector<8x96xf32> to vector<8x32xf32>
    %611 = vector.extract_strided_slice %607 {offsets = [0, 32], sizes = [8, 32], strides = [1, 1]} : vector<8x96xf32> to vector<8x32xf32>
    %612 = vector.extract_strided_slice %607 {offsets = [0, 64], sizes = [8, 32], strides = [1, 1]} : vector<8x96xf32> to vector<8x32xf32>
    %613 = arith.mulf %611, %588 : vector<8x32xf32>
    %614 = arith.mulf %610, %609 : vector<8x32xf32>
    %615 = arith.addf %613, %614 : vector<8x32xf32>
    %616 = math.tanh %615 : vector<8x32xf32>
    %617 = arith.mulf %612, %616 : vector<8x32xf32>
    %618 = vector.extract_strided_slice %601 {offsets = [0, 0], sizes = [8, 96], strides = [1, 1]} : vector<8x128xf32> to vector<8x96xf32>
    %619 = arith.negf %618 : vector<8x96xf32>
    %620 = math.exp %619 : vector<8x96xf32>
    %cst_136 = arith.constant 1.000000e+00 : f32
    %621 = vector.broadcast %cst_136 : f32 to vector<8x96xf32>
    %622 = arith.addf %621, %620 : vector<8x96xf32>
    %623 = arith.divf %621, %622 : vector<8x96xf32>
    %624 = vector.extract_strided_slice %601 {offsets = [0, 96], sizes = [8, 32], strides = [1, 1]} : vector<8x128xf32> to vector<8x32xf32>
    %625 = math.tanh %624 : vector<8x32xf32>
    %626 = vector.extract_strided_slice %623 {offsets = [0, 0], sizes = [8, 32], strides = [1, 1]} : vector<8x96xf32> to vector<8x32xf32>
    %627 = vector.extract_strided_slice %623 {offsets = [0, 32], sizes = [8, 32], strides = [1, 1]} : vector<8x96xf32> to vector<8x32xf32>
    %628 = vector.extract_strided_slice %623 {offsets = [0, 64], sizes = [8, 32], strides = [1, 1]} : vector<8x96xf32> to vector<8x32xf32>
    %629 = arith.mulf %627, %590 : vector<8x32xf32>
    %630 = arith.mulf %626, %625 : vector<8x32xf32>
    %631 = arith.addf %629, %630 : vector<8x32xf32>
    %632 = math.tanh %631 : vector<8x32xf32>
    %633 = arith.mulf %628, %632 : vector<8x32xf32>
    %634 = vector.broadcast %c11_i32_127 : i32 to vector<8x32xi32>
    %635 = arith.cmpi slt, %634, %26 : vector<8x32xi32>
    %636 = vector.broadcast %c11_i32_127 : i32 to vector<8x32xi32>
    %637 = arith.cmpi sge, %636, %28 : vector<8x32xi32>
    %638 = arith.select %635, %617, %587 : vector<8x32xi1>, vector<8x32xf32>
    %639 = arith.select %635, %615, %588 : vector<8x32xi1>, vector<8x32xf32>
    %640 = arith.select %637, %633, %589 : vector<8x32xi1>, vector<8x32xf32>
    %641 = arith.select %637, %631, %590 : vector<8x32xi1>, vector<8x32xf32>
    %c12_i32_137 = arith.constant 12 : i32
    %c0_138 = arith.constant 0 : index
    %c0_139 = arith.constant 0 : index
    %c0_140 = arith.constant 0 : index
    %642 = vector.load %arg6[%c0_138, %c0_139, %c0_140] : memref<2x32x4xf32, #tpu.memory_space<vmem>>, vector<1x32x4xf32>
    %643 = vector.shape_cast %642 : vector<1x32x4xf32> to vector<32x4xf32>
    %cst_141 = arith.constant dense<0.000000e+00> : vector<8x4xf32>
    %644 = tpu.matmul %638, %643, %cst_141 {dimension_numbers = #tpu.dot_dimension_numbers<[1], [0], [0], [1], [0, 0, 1, 1], [], []>} : vector<8x32xf32>, vector<32x4xf32>, vector<8x4xf32> -> vector<8x4xf32>
    %c1_142 = arith.constant 1 : index
    %c0_143 = arith.constant 0 : index
    %c0_144 = arith.constant 0 : index
    %645 = vector.load %arg6[%c1_142, %c0_143, %c0_144] : memref<2x32x4xf32, #tpu.memory_space<vmem>>, vector<1x32x4xf32>
    %646 = vector.shape_cast %645 : vector<1x32x4xf32> to vector<32x4xf32>
    %cst_145 = arith.constant dense<0.000000e+00> : vector<8x4xf32>
    %647 = tpu.matmul %640, %646, %cst_145 {dimension_numbers = #tpu.dot_dimension_numbers<[1], [0], [0], [1], [0, 0, 1, 1], [], []>} : vector<8x32xf32>, vector<32x4xf32>, vector<8x4xf32> -> vector<8x4xf32>
    %648 = arith.addf %644, %647 : vector<8x4xf32>
    %c0_146 = arith.constant 0 : index
    %c0_147 = arith.constant 0 : index
    %649 = vector.load %arg7[%c0_146, %c0_147] : memref<1x4xf32, #tpu.memory_space<vmem>>, vector<1x4xf32>
    %650 = vector.broadcast %649 : vector<1x4xf32> to vector<8x4xf32>
    %651 = arith.addf %648, %650 : vector<8x4xf32>
    %c0_148 = arith.constant 0 : index
    %c0_149 = arith.constant 0 : index
    %652 = vector.load %arg8[%c0_148, %c0_149] : memref<8x4xf32, #tpu.memory_space<vmem>>, vector<8x4xf32>
    tpu.vector_store %arg8[%c0_148, %c0_149], %651 {strides = array<i32>} : memref<8x4xf32, #tpu.memory_space<vmem>>, vector<8x4xf32>,
    return
  }
  func.func @transform_0(%arg0: i32) -> (i32, i32) {
    %c0_i32 = arith.constant 0 : i32
    %c0_i32_0 = arith.constant 0 : i32
    %c0_i32_1 = arith.constant 0 : i32
    return %c0_i32, %c0_i32_0 : i32, i32
  }
  func.func @transform_1(%arg0: i32) -> (i32, i32, i32) {
    %c0_i32 = arith.constant 0 : i32
    %c0_i32_0 = arith.constant 0 : i32
    %c0_i32_1 = arith.constant 0 : i32
    %c0_i32_2 = arith.constant 0 : i32
    return %c0_i32, %c0_i32_0, %c0_i32_1 : i32, i32, i32
  }
  func.func @transform_2(%arg0: i32) -> (i32, i32, i32) {
    %c0_i32 = arith.constant 0 : i32
    %c0_i32_0 = arith.constant 0 : i32
    %c0_i32_1 = arith.constant 0 : i32
    %c0_i32_2 = arith.constant 0 : i32
    return %c0_i32, %c0_i32_0, %c0_i32_1 : i32, i32, i32
  }
  func.func @transform_3(%arg0: i32) -> (i32, i32, i32) {
    %c0_i32 = arith.constant 0 : i32
    %c0_i32_0 = arith.constant 0 : i32
    %c0_i32_1 = arith.constant 0 : i32
    %c0_i32_2 = arith.constant 0 : i32
    return %c0_i32, %c0_i32_0, %c0_i32_1 : i32, i32, i32
  }
  func.func @transform_4(%arg0: i32) -> (i32, i32, i32) {
    %c0_i32 = arith.constant 0 : i32
    %c0_i32_0 = arith.constant 0 : i32
    %c0_i32_1 = arith.constant 0 : i32
    %c0_i32_2 = arith.constant 0 : i32
    return %c0_i32, %c0_i32_0, %c0_i32_1 : i32, i32, i32
  }
  func.func @transform_5(%arg0: i32) -> (i32, i32, i32) {
    %c0_i32 = arith.constant 0 : i32
    %c0_i32_0 = arith.constant 0 : i32
    %c0_i32_1 = arith.constant 0 : i32
    %c0_i32_2 = arith.constant 0 : i32
    return %c0_i32, %c0_i32_0, %c0_i32_1 : i32, i32, i32
  }
  func.func @transform_6(%arg0: i32) -> (i32, i32) {
    %c0_i32 = arith.constant 0 : i32
    %c0_i32_0 = arith.constant 0 : i32
    %c0_i32_1 = arith.constant 0 : i32
    return %c0_i32, %c0_i32_0 : i32, i32
  }
  func.func @transform_7(%arg0: i32) -> (i32, i32) {
    %c0_i32 = arith.constant 0 : i32
    %c0_i32_0 = arith.constant 0 : i32
    %c0_i32_1 = arith.constant 0 : i32
    return %c0_i32, %c0_i32_0 : i32, i32
  }
}

</mosaic_0001>

<bundles_post_ra>
// kernel: textrnn_forward.1
= control target key start
LH: loop header
LB: loop body
LE: loop exit
PB: predicated region body
PF: predicated region fallthrough
CT: control target
= control target key end

     0   :  { %vm49_vm0 = vcmask 261120   ;;  %v3863_v12 = vmov 0.0   ;;  %vm3864_vm1 = vmmov 0   ;;  %v3865_v29 = vmov 0   ;;  %s4908_s2 = inlined_call_operand.vmem [shape: f32[2,32,128], index: 2, kind: input, shape index: {}]   ;;  %s4909_s1 = inlined_call_operand.vmem [shape: f32[12,8,32], index: 1, kind: input, shape index: {}]   ;;  %s4910_s3 = inlined_call_operand.vmem [shape: f32[2,32,128], index: 3, kind: input, shape index: {}]   ;;  %s4911_s4 = inlined_call_operand.vmem [shape: f32[2,1,128], index: 4, kind: input, shape index: {}]   ;;  %s4912_s0 = inlined_call_operand.vmem [shape: s32[8,1], index: 0, kind: input, shape index: {}]   ;;  %s4913_s5 = inlined_call_operand.vmem [shape: f32[2,32,4], index: 5, kind: input, shape index: {}]   ;;  %s4914_s6 = inlined_call_operand.vmem [shape: f32[1,4], index: 6, kind: input, shape index: {}]   ;;  %s4915_s7 = inlined_call_operand.vmem [shape: f32[8,4], index: 7, kind: output, shape index: {}]  }
   0x1   :  { %v41_v0 = vld [vmem:[%s4908_s2 + $0x18] sm:$0xff]  ;;  %v40_v1 = vld [vmem:[%s4908_s2 + $0x10] sm:$0xff]  ;;  %v39_v4 = vld [vmem:[%s4908_s2 + $0x8] sm:$0xff]  ;;  %3662 = vset.pattern.permute.xlu0 %v3865_v29 }
   0x2   :  { %v3085_v2 = vld [vmem:[%s4908_s2 + $0x38] sm:$0xff]  ;;  %3319 = vmatprep.subr.mxu0 %v41_v0  ;;  %v3084_v3 = vld [vmem:[%s4908_s2 + $0x30] sm:$0xff]  ;;  %v26_v5 = vld [vmem:[%s4909_s1] sm:$0xff] }
   0x3   :  { %3345 = vmatprep.subr.mxu1 %v3085_v2  ;;  %3320 = vmatpush3.msra.mxu0 %v41_v0  ;;  %v3083_v6 = vld [vmem:[%s4908_s2 + $0x28] sm:$0xff]  ;;  %v38_v7 = vld [vmem:[%s4908_s2] sm:$0xff]  ;;  %v3942_v10 = vld [vmem:[%s4910_s3 + $0x18] sm:$0xff] }
   0x4   :  { %3346 = vmatpush3.msra.mxu1 %v3085_v2  ;;  %3321 = vmatprep.subr.mxu0 %v40_v1  ;;  %v3082_v8 = vld [vmem:[%s4908_s2 + $0x20] sm:$0xff]  ;;  %v27_v9 = vld [vmem:[%s4909_s1 + $0x8] sm:$0xff]  ;;  %v28_v11 = vld [vmem:[%s4909_s1 + $0x10] sm:$0xff] }
   0x5   :  { %3347 = vmatprep.subr.mxu1 %v3084_v3  ;;  %3322 = vmatpush3.msra.mxu0 %v40_v1  ;;  %v29_v13 = vld [vmem:[%s4909_s1 + $0x18] sm:$0xff]  ;;  %v30_v15 = vld [vmem:[%s4909_s1 + $0x20] sm:$0xff]  ;;  %v3968_v16 = vld [vmem:[%s4910_s3 + $0x10] sm:$0xff] }
   0x6   :  { %3348 = vmatpush3.msra.mxu1 %v3084_v3  ;;  %3323 = vmatprep.subr.mxu0 %v39_v4  ;;  %v3956_v14 = vld [vmem:[%s4910_s3 + $0x38] sm:$0xff]  ;;  %v31_v17 = vld [vmem:[%s4909_s1 + $0x28] sm:$0xff]  ;;  %v32_v18 = vld [vmem:[%s4909_s1 + $0x30] sm:$0xff] }
   0x7   :  { %3327 = vmatprep.mubr.msk.f32.mxu0 %vm49_vm0, %v26_v5  ;;  %3324 = vmatpush3.msra.mxu0 %v39_v4  ;;  %v3985_v19 = vld [vmem:[%s4910_s3 + $0x30] sm:$0xff]  ;;  %v3994_v20 = vld [vmem:[%s4910_s3 + $0x8] sm:$0xff]  ;;  %v33_v21 = vld [vmem:[%s4909_s1 + $0x38] sm:$0xff] }
   0x8   :  { %3349 = vmatprep.subr.mxu1 %v3083_v6  ;;  %3325 = vmatprep.subr.mxu0 %v38_v7  ;;  %v34_v22 = vld [vmem:[%s4909_s1 + $0x40] sm:$0xff]  ;;  %v4009_v23 = vld [vmem:[%s4910_s3 + $0x28] sm:$0xff]  ;;  %v36_v26 = vld [vmem:[%s4909_s1 + $0x50] sm:$0xff] }
   0x9   :  { %3350 = vmatpush3.msra.mxu1 %v3083_v6  ;;  %3326 = vmatpush3.msra.mxu0 %v38_v7  ;;  %v4018_v24 = vld [vmem:[%s4910_s3] sm:$0xff]  ;;  %v35_v25 = vld [vmem:[%s4909_s1 + $0x48] sm:$0xff]  ;;  %v37_v28 = vld [vmem:[%s4909_s1 + $0x58] sm:$0xff] }
   0xa   :  { %3351 = vmatprep.subr.mxu1 %v3082_v8  ;;  %3328 = vmatmul.mubr.msk.f32.vlgmr.msra.gmra.mxu0 %vm49_vm0, %v27_v9  ;;  %v4033_v27 = vld [vmem:[%s4910_s3 + $0x20] sm:$0xff] }
   0xb   :  { %3371 = vmatprep.subr.mxu0 %v3863_v12  ;;  %3352 = vmatpush3.msra.mxu1 %v3082_v8  ;;  %v3069_v30 = vld [vmem:[%s4911_s4] ss:$0 sm:$0xff]  ;;  %v3087_v33 = vld [vmem:[%s4911_s4 + $0x1] ss:$0 sm:$0xff]  ;;  %s3866_s4 = smov 32  }
   0xc   :  { %3372 = vmatpush3.msra.mxu0 %v3942_v10  ;;  %3353 = vmatprep.mubr.msk.f32.mxu1 %vm49_vm0, %v26_v5 }
   0xd   :  { %3330 = vmatprep.mubr.msk.f32.mxu0 %vm49_vm0, %v28_v11  ;;  %3354 = vmatmul.mubr.msk.f32.vlgmr.msra.gmra.mxu1 %vm49_vm0, %v27_v9 }
   0xe   :  { %3382 = vmatprep.subr.mxu1 %v3863_v12  ;;  %3331 = vmatmul.mubr.msk.f32.gmra.mxu0 %vm49_vm0, %v29_v13 }
   0xf   :  { %3383 = vmatpush3.msra.mxu1 %v3956_v14  ;;  %3356 = vmatprep.mubr.msk.f32.mxu1 %vm49_vm0, %v28_v11 }
  0x10   :  { %3373 = vmatprep.subr.mxu0 %v3863_v12  ;;  %3333 = vmatprep.mubr.msk.f32.mxu0 %vm49_vm0, %v30_v15 }
  0x11   :  { %3374 = vmatpush3.msra.mxu0 %v3968_v16  ;;  %3357 = vmatmul.mubr.msk.f32.gmra.mxu1 %vm49_vm0, %v29_v13 }
  0x12   :  { %3384 = vmatprep.subr.mxu1 %v3863_v12  ;;  %3334 = vmatmul.mubr.msk.f32.gmra.mxu0 %vm49_vm0, %v31_v17 }
  0x13   :  { %3359 = vmatprep.mubr.msk.f32.mxu1 %vm49_vm0, %v30_v15  ;;  %3336 = vmatprep.mubr.msk.f32.mxu0 %vm49_vm0, %v32_v18 }
  0x14   :  { %3385 = vmatpush3.msra.mxu1 %v3985_v19  ;;  %3375 = vmatprep.subr.mxu0 %v3863_v12 }
  0x15   :  { %3386 = vmatprep.subr.mxu1 %v3863_v12  ;;  %3360 = vmatmul.mubr.msk.f32.gmra.mxu1 %vm49_vm0, %v31_v17 }
  0x16   :  { %3376 = vmatpush3.msra.mxu0 %v3994_v20  ;;  %3362 = vmatprep.mubr.msk.f32.mxu1 %vm49_vm0, %v32_v18 }
  0x17   :  { %3337 = vmatmul.mubr.msk.f32.gmra.mxu0 %vm49_vm0, %v33_v21  ;;  %3387 = vmatpush3.msra.mxu1 %v4009_v23 }
  0x18   :  { %3339 = vmatprep.mubr.msk.f32.mxu0 %vm49_vm0, %v34_v22  ;;  %3377 = vmatprep.subr.mxu0 %v3863_v12 }
  0x19   :  { %3388 = vmatprep.subr.mxu1 %v3863_v12  ;;  %3363 = vmatmul.mubr.msk.f32.gmra.mxu1 %vm49_vm0, %v33_v21 }
  0x1a   :  { %3378 = vmatpush3.msra.mxu0 %v4018_v24  ;;  %3365 = vmatprep.mubr.msk.f32.mxu1 %vm49_vm0, %v34_v22 }
  0x1b   :  { %3340 = vmatmul.mubr.msk.f32.gmra.mxu0 %vm49_vm0, %v35_v25  ;;  %3389 = vmatpush3.msra.mxu1 %v4033_v27 }
  0x1c   :  { %3342 = vmatprep.mubr.msk.f32.mxu0 %vm49_vm0, %v36_v26  ;;  %3393 = vmatprep.subr.mxu0 %v3863_v12 }
  0x1d   :  { %3404 = vmatprep.subr.mxu1 %v3863_v12  ;;  %3366 = vmatmul.mubr.msk.f32.gmra.mxu1 %vm49_vm0, %v35_v25 }
  0x1e   :  { %3368 = vmatprep.mubr.msk.f32.mxu1 %vm49_vm0, %v36_v26 }
  0x1f   :  { %3343 = vmatmul.mubr.msk.f32.gmra.mxu0 %vm49_vm0, %v37_v28 }
  0x20   :  { %3379 = vmatprep.mubr.msk.f32.mxu0 %vm3864_vm1, %v3863_v12 }
  0x21   :  { %3369 = vmatmul.mubr.msk.f32.gmra.mxu1 %vm49_vm0, %v37_v28 }
  0x22   :  { %3390 = vmatprep.mubr.msk.f32.mxu1 %vm3864_vm1, %v3863_v12 }
  0x23   :  { %3380 = vmatmul.mubr.f32.vlgmr.msra.gmra.mxu0 %v3863_v12 }
  0x24   :  { %3394 = vmatpush3.msra.mxu0 %v3942_v10  ;;  %3401 = vmatprep.mubr.msk.f32.mxu0 %vm3864_vm1, %v3863_v12 }
  0x25   :  { %3395 = vmatprep.subr.mxu0 %v3863_v12  ;;  %3391 = vmatmul.mubr.f32.vlgmr.msra.gmra.mxu1 %v3863_v12 }
  0x26   :  { %3396 = vmatpush3.msra.mxu0 %v3968_v16  ;;  %3405 = vmatpush3.msra.mxu1 %v3956_v14 }
  0x27   :  { %3397 = vmatprep.subr.mxu0 %v3863_v12  ;;  %3406 = vmatprep.subr.mxu1 %v3863_v12 }
  0x28   :  { %3398 = vmatpush3.msra.mxu0 %v3994_v20  ;;  %3407 = vmatpush3.msra.mxu1 %v3985_v19 }
  0x29   :  { %3399 = vmatprep.subr.mxu0 %v3863_v12  ;;  %3408 = vmatprep.subr.mxu1 %v3863_v12 }
  0x2a   :  { %3400 = vmatpush3.msra.mxu0 %v4018_v24  ;;  %3409 = vmatpush3.msra.mxu1 %v4009_v23 }
  0x2b   :  { %3412 = vmatprep.mubr.msk.f32.mxu1 %vm3864_vm1, %v3863_v12  ;;  %3410 = vmatprep.subr.mxu1 %v3863_v12 }
  0x2c   :  { %3415 = vmatprep.subr.mxu0 %v3863_v12  ;;  %3411 = vmatpush3.msra.mxu1 %v4033_v27 }
  0x2d   :  { %3426 = vmatprep.subr.mxu1 %v3863_v12 }
  0xca   :  { %v3329_v31 = vpop.f32.mrf.mxu0 }
  0xcb   :  { %v4079_v32 = vadd.f32 %v3329_v31, %v3069_v30 }
  0xcc   :  { %v152_v34 = vpop.f32.mrf.mxu0 }
  0xcd   :  { %v3355_v35 = vpop.f32.mrf.mxu1  ;;  %v153_v11 = vadd.f32 %v3069_v30, %v152_v34 }
  0xce   :  { %v4084_v36 = vadd.f32 %v3355_v35, %v3087_v33  ;;  %v3332_v37 = vpop.f32.mrf.mxu0 }
  0xcf   :  { %v4086_v38 = vadd.f32 %v3332_v37, %v3069_v30  ;;  %v302_v39 = vpop.f32.mrf.mxu1 }
  0xd0   :  { %v4088_v40 = vadd.f32 %v3087_v33, %v302_v39  ;;  %v162_v41 = vpop.f32.mrf.mxu0 }
  0xd1   :  { %v4090_v42 = vadd.f32 %v3069_v30, %v162_v41  ;;  %v3358_v43 = vpop.f32.mrf.mxu1 }
  0xd2   :  { %v4092_v44 = vadd.f32 %v3358_v43, %v3087_v33  ;;  %v3335_v45 = vpop.f32.mrf.mxu0 }
  0xd3   :  { %v4094_v46 = vadd.f32 %v3335_v45, %v3069_v30  ;;  %v312_v47 = vpop.f32.mrf.mxu1 }
  0xd4   :  { %v4096_v48 = vadd.f32 %v3087_v33, %v312_v47  ;;  %v172_v49 = vpop.f32.mrf.mxu0 }
  0xd5   :  { %v4098_v50 = vadd.f32 %v3069_v30, %v172_v49  ;;  %v3361_v51 = vpop.f32.mrf.mxu1 }
  0xd6   :  { %v4100_v52 = vadd.f32 %v3361_v51, %v3087_v33 }
  0xd7   :  { %v3338_v53 = vpop.f32.mrf.mxu0  ;;  %v322_v55 = vpop.f32.mrf.mxu1 }
  0xd8   :  { %v4102_v54 = vadd.f32 %v3338_v53, %v3069_v30  ;;  %v4104_v56 = vadd.f32 %v3087_v33, %v322_v55 }
  0xd9   :  { %v182_v57 = vpop.f32.mrf.mxu0  ;;  %v3364_v59 = vpop.f32.mrf.mxu1 }
  0xda   :  { %v4106_v58 = vadd.f32 %v3069_v30, %v182_v57  ;;  %v4108_v60 = vadd.f32 %v3364_v59, %v3087_v33 }
  0xdb   :  { %v3341_v61 = vpop.f32.mrf.mxu0  ;;  %v332_v63 = vpop.f32.mrf.mxu1 }
  0xdc   :  { %v4110_v62 = vadd.f32 %v3341_v61, %v3069_v30  ;;  %v4112_v0 = vadd.f32 %v3087_v33, %v332_v63 }
  0xdd   :  { %v192_v1 = vpop.f32.mrf.mxu0  ;;  %v3367_v3 = vpop.f32.mrf.mxu1 }
  0xde   :  { %v4114_v2 = vadd.f32 %v3069_v30, %v192_v1  ;;  %v4116_v4 = vadd.f32 %v3367_v3, %v3087_v33 }
  0xdf   :  { %v3344_v5 = vpop.f32.mrf.mxu0  ;;  %v342_v7 = vpop.f32.mrf.mxu1 }
  0xe0   :  { %v4118_v6 = vadd.f32 %v3344_v5, %v3069_v30  ;;  %v4120_v8 = vadd.f32 %v3087_v33, %v342_v7 }
  0xe1   :  { %v202_v9 = vpop.f32.mrf.mxu0  ;;  %v3370_v15 = vpop.f32.mrf.mxu1 }
  0xe2   :  { %v4122_v13 = vadd.f32 %v3069_v30, %v202_v9  ;;  %v358_v17 = vadd.f32 %v3370_v15, %v3087_v33  ;;  %v382_v30 = vld [vmem:[%s4912_s0] sm:$0xff]  ;;  %s3867_s0 = smov 64  }
  0xe3   :  { %v457_v18 = vpop.f32.mrf.mxu0  ;;  %v352_v22 = vpop.f32.mrf.mxu1 }
  0xe4   :  { %v461_v21 = vadd.f32 %v457_v18, %v153_v11  ;;  %v4124_v25 = vadd.f32 %v3087_v33, %v352_v22 }
  0xe5   :  { %v3381_v26 = vpop.f32.mrf.mxu0  ;;  %v530_v28 = vpop.f32.mrf.mxu1 }
  0xe6   :  { %3663 = vtanh.f32 %v461_v21  ;;  %v534_v29 = vadd.f32 %v530_v28, %v358_v17  ;;  %v3104_v33 = vmul.f32 -1.442695, %v461_v21 }
  0xe7   :  { %v3392_v31 = vpop.f32.mrf.mxu1 }
  0xe8   :  { %3665 = vtanh.f32 %v534_v29  ;;  %v3105_v37 = vmul.f32 -1.442695, %v534_v29 }
  0xe9   :  { %3667 = vpow2.f32 %v3104_v33 }
  0xea   :  { %3669 = vpow2.f32 %v3105_v37 }
  0xf3   :  { %v3664_v35 = vpop.eup %3663 }
  0xf4   :  { %544 = vrot.lane.b32.xlu0 %v3664_v35, %s3866_s4 }
  0xf5   :  { %v3666_v34 = vpop.eup %3665 }
  0xf6   :  { %v3668_v39 = vpop.eup %3667 }
  0xf7   :  { %v538_v41 = vadd.f32 1.0, %v3668_v39  ;;  %v3670_v43 = vpop.eup %3669 }
  0xf8   :  { %568 = vrot.lane.b32.xlu0 %v3666_v34, %s3866_s4  ;;  %v562_v45 = vadd.f32 1.0, %v3670_v43 }
  0xf9   :  { %3671 = vrcp.f32 %v538_v41 }
  0xfa   :  { %3673 = vrcp.f32 %v562_v45 }
  0xfc   :  { %384 = vperm.xlu0 %3662, %v382_v30  }
 0x106   :  { %v3672_v47 = vpop.eup %3671 }
 0x107   :  { %v3674_v53 = vpop.eup %3673  ;;  %v542_v59 = vmul.f32 0.0, %v3672_v47 }
 0x108   :  { %v566_v1 = vmul.f32 0.0, %v3674_v53 }
 0x166   :  { %v545_v49 = vpop.permute.xlu0 %544 }
 0x167   :  { %v547_v51 = vmul.f32 %v3672_v47, %v545_v49 }
 0x169   :  { %549 = vrot.lane.b32.xlu1 %v547_v51, %s3866_s4 }
 0x16a   :  { %v569_v55 = vpop.permute.xlu0 %568 }
 0x16b   :  { %v571_v57 = vmul.f32 %v3674_v53, %v569_v55 }
 0x16d   :  { %573 = vrot.lane.b32.xlu1 %v571_v57, %s3866_s4 }
 0x177   :  { %v4141_v11 = vpop.permute.xlu0 %384 }
 0x178   :  { %v4144_v18 = vsub.s32 12, %v4141_v11  ;;  %vm583_vm2 = vcmp.gt.s32.totalorder %v4141_v11, 0  ;;  %vm793_vm4 = vcmp.gt.s32.totalorder %v4141_v11, 1  ;;  %vm1003_vm6 = vcmp.gt.s32.totalorder %v4141_v11, 2 }
 0x179   :  { %vm1213_vm8 = vcmp.gt.s32.totalorder %v4141_v11, 3  ;;  %vm1423_vm10 = vcmp.gt.s32.totalorder %v4141_v11, 4  ;;  %vm1633_vm12 = vcmp.gt.s32.totalorder %v4141_v11, 5  ;;  %vm1843_vm14 = vcmp.gt.s32.totalorder %v4141_v11, 6 }
 0x17a   :  { %vm584_vm3 = vcmp.le.s32.totalorder %v4144_v18, 0  ;;  %vm794_vm5 = vcmp.le.s32.totalorder %v4144_v18, 1  ;;  %vm1004_vm7 = vcmp.le.s32.totalorder %v4144_v18, 2  ;;  %vm1214_vm9 = vcmp.le.s32.totalorder %v4144_v18, 3 }
 0x17b   :  { %vm1424_vm11 = vcmp.le.s32.totalorder %v4144_v18, 4  ;;  %vm1634_vm13 = vcmp.le.s32.totalorder %v4144_v18, 5  ;;  %vm1844_vm15 = vcmp.le.s32.totalorder %v4144_v18, 6 }
 0x1db   :  { %v550_v61 = vpop.permute.xlu1 %549 }
 0x1dc   :  { %v4133_v63 = vadd.f32 %v550_v61, %v542_v59 }
 0x1de   :  { %3675 = vtanh.f32 %v4133_v63 }
 0x1df   :  { %v574_v3 = vpop.permute.xlu1 %573 }
 0x1e0   :  { %v4136_v5 = vadd.f32 %v574_v3, %v566_v1  ;;  %v4191_v3 = vsel %vm583_vm2, %v4133_v63, 0.0 }
 0x1e2   :  { %3677 = vtanh.f32 %v4136_v5 }
 0x1eb   :  { %v3676_v7 = vpop.eup %3675 }
 0x1ec   :  { %555 = vrot.lane.b32.xlu1 %v3676_v7, %s3866_s4 }
 0x1ef   :  { %v3678_v9 = vpop.eup %3677 }
 0x1f0   :  { %579 = vrot.lane.b32.xlu1 %v3678_v9, %s3866_s4 }
 0x25e   :  { %v556_v15 = vpop.permute.xlu1 %555 }
 0x25f   :  { %v558_v17 = vmul.f32 %v3672_v47, %v556_v15 }
 0x261   :  { %v4149_v21 = vsel %vm583_vm2, %v558_v17, 0.0  ;;  %v4199_v17 = vsel %vm584_vm3, %v4136_v5, 0.0  ;;  %vm2053_vm2 = vcmp.gt.s32.totalorder %v4141_v11, 7 }
 0x262   :  { %v580_v22 = vpop.permute.xlu1 %579  ;;  %592 = vrot.lane.b32.xlu0 %v4149_v21, %s3867_s0 }
 0x263   :  { %v582_v26 = vmul.f32 %v3674_v53, %v580_v22 }
 0x265   :  { %v4156_v28 = vsel %vm584_vm3, %v582_v26, 0.0  ;;  %vm2054_vm3 = vcmp.le.s32.totalorder %v4144_v18, 7 }
 0x266   :  { %670 = vrot.lane.b32.xlu1 %v4156_v28, %s3867_s0 }
 0x2d4   :  { %v593_v29 = vpop.permute.xlu0 %592 }
 0x2d5   :  { %3402 = vmatmul.mubr.msk.f32.vlgmr.msra.gmra.mxu0 %vm49_vm0, %v593_v29 }
 0x2d6   :  { %3416 = vmatpush3.msra.mxu0 %v3942_v10  ;;  %3423 = vmatprep.mubr.msk.f32.mxu0 %vm3864_vm1, %v3863_v12 }
 0x2d7   :  { %3417 = vmatprep.subr.mxu0 %v3863_v12 }
 0x2d8   :  { %v671_v31 = vpop.permute.xlu1 %670  ;;  %3418 = vmatpush3.msra.mxu0 %v3968_v16 }
 0x2d9   :  { %3413 = vmatmul.mubr.msk.f32.vlgmr.msra.gmra.mxu1 %vm49_vm0, %v671_v31  ;;  %3419 = vmatprep.subr.mxu0 %v3863_v12 }
 0x2da   :  { %3420 = vmatpush3.msra.mxu0 %v3994_v20  ;;  %3427 = vmatpush3.msra.mxu1 %v3956_v14 }
 0x2db   :  { %3421 = vmatprep.subr.mxu0 %v3863_v12  ;;  %3428 = vmatprep.subr.mxu1 %v3863_v12 }
 0x2dc   :  { %3422 = vmatpush3.msra.mxu0 %v4018_v24  ;;  %3429 = vmatpush3.msra.mxu1 %v3985_v19 }
 0x2dd   :  { %3430 = vmatprep.subr.mxu1 %v3863_v12  ;;  %3434 = vmatprep.mubr.msk.f32.mxu1 %vm3864_vm1, %v3863_v12 }
 0x2de   :  { %3431 = vmatpush3.msra.mxu1 %v4009_v23  ;;  %3437 = vmatprep.subr.mxu0 %v3863_v12 }
 0x2df   :  { %3432 = vmatprep.subr.mxu1 %v3863_v12 }
 0x2e0   :  { %3433 = vmatpush3.msra.mxu1 %v4033_v27 }
 0x2e1   :  { %3448 = vmatprep.subr.mxu1 %v3863_v12 }
 0x395   :  { %v662_v35 = vpop.f32.mrf.mxu0 }
 0x396   :  { %v666_v34 = vadd.f32 %v662_v35, %v4079_v32 }
 0x397   :  { %v3403_v30 = vpop.f32.mrf.mxu0 }
 0x398   :  { %3679 = vtanh.f32 %v666_v34  ;;  %v3108_v45 = vmul.f32 -1.442695, %v666_v34 }
 0x399   :  { %v740_v33 = vpop.f32.mrf.mxu1 }
 0x39a   :  { %v744_v37 = vadd.f32 %v740_v33, %v4124_v25 }
 0x39b   :  { %v3414_v39 = vpop.f32.mrf.mxu1 }
 0x39c   :  { %3681 = vtanh.f32 %v744_v37  ;;  %v3109_v47 = vmul.f32 -1.442695, %v744_v37 }
 0x39d   :  { %3683 = vpow2.f32 %v3108_v45 }
 0x39e   :  { %3685 = vpow2.f32 %v3109_v47 }
 0x3a5   :  { %v3680_v41 = vpop.eup %3679 }
 0x3a6   :  { %754 = vrot.lane.b32.xlu0 %v3680_v41, %s3866_s4 }
 0x3a9   :  { %v3682_v43 = vpop.eup %3681 }
 0x3aa   :  { %778 = vrot.lane.b32.xlu1 %v3682_v43, %s3866_s4  ;;  %v3684_v49 = vpop.eup %3683 }
 0x3ab   :  { %v748_v51 = vadd.f32 1.0, %v3684_v49  ;;  %v3686_v32 = vpop.eup %3685 }
 0x3ac   :  { %v772_v53 = vadd.f32 1.0, %v3686_v32 }
 0x3ad   :  { %3687 = vrcp.f32 %v748_v51 }
 0x3ae   :  { %3689 = vrcp.f32 %v772_v53 }
 0x3ba   :  { %v3688_v55 = vpop.eup %3687 }
 0x3bb   :  { %v3690_v59 = vpop.eup %3689  ;;  %v752_v7 = vmul.f32 %v3688_v55, %v4191_v3 }
 0x3bc   :  { %v776_v22 = vmul.f32 %v3690_v59, %v4199_v17 }
 0x418   :  { %v755_v25 = vpop.permute.xlu0 %754 }
 0x419   :  { %v757_v57 = vmul.f32 %v3688_v55, %v755_v25 }
 0x41b   :  { %759 = vrot.lane.b32.xlu0 %v757_v57, %s3866_s4 }
 0x41c   :  { %v779_v61 = vpop.permute.xlu1 %778 }
 0x41d   :  { %v781_v1 = vmul.f32 %v3690_v59, %v779_v61 }
 0x41f   :  { %783 = vrot.lane.b32.xlu1 %v781_v1, %s3866_s4 }
 0x48d   :  { %v760_v9 = vpop.permute.xlu0 %759 }
 0x48e   :  { %v4194_v15 = vadd.f32 %v760_v9, %v752_v7 }
 0x490   :  { %3691 = vtanh.f32 %v4194_v15 }
 0x491   :  { %v784_v26 = vpop.permute.xlu1 %783 }
 0x492   :  { %v4203_v29 = vadd.f32 %v784_v26, %v776_v22  ;;  %v4256_v26 = vsel %vm793_vm4, %v4194_v15, %v4191_v3 }
 0x494   :  { %3693 = vtanh.f32 %v4203_v29 }
 0x49d   :  { %v3692_v63 = vpop.eup %3691 }
 0x49e   :  { %765 = vrot.lane.b32.xlu0 %v3692_v63, %s3866_s4 }
 0x4a1   :  { %v3694_v31 = vpop.eup %3693 }
 0x4a2   :  { %789 = vrot.lane.b32.xlu1 %v3694_v31, %s3866_s4 }
 0x510   :  { %v766_v35 = vpop.permute.xlu0 %765 }
 0x511   :  { %v768_v34 = vmul.f32 %v3688_v55, %v766_v35 }
 0x513   :  { %v4212_v5 = vsel %vm793_vm4, %v768_v34, %v4149_v21  ;;  %v4265_v34 = vsel %vm794_vm5, %v4203_v29, %v4199_v17  ;;  %vm2263_vm4 = vcmp.gt.s32.totalorder %v4141_v11, 8 }
 0x514   :  { %802 = vrot.lane.b32.xlu0 %v4212_v5, %s3867_s0  ;;  %v790_v30 = vpop.permute.xlu1 %789 }
 0x515   :  { %v792_v33 = vmul.f32 %v3690_v59, %v790_v30 }
 0x517   :  { %v4220_v37 = vsel %vm794_vm5, %v792_v33, %v4156_v28  ;;  %vm2264_vm5 = vcmp.le.s32.totalorder %v4144_v18, 8 }
 0x518   :  { %880 = vrot.lane.b32.xlu1 %v4220_v37, %s3867_s0 }
 0x586   :  { %v803_v39 = vpop.permute.xlu0 %802 }
 0x587   :  { %3424 = vmatmul.mubr.msk.f32.vlgmr.msra.gmra.mxu0 %vm49_vm0, %v803_v39 }
 0x588   :  { %3438 = vmatpush3.msra.mxu0 %v3942_v10  ;;  %3445 = vmatprep.mubr.msk.f32.mxu0 %vm3864_vm1, %v3863_v12 }
 0x589   :  { %3439 = vmatprep.subr.mxu0 %v3863_v12 }
 0x58a   :  { %v881_v21 = vpop.permute.xlu1 %880  ;;  %3440 = vmatpush3.msra.mxu0 %v3968_v16 }
 0x58b   :  { %3435 = vmatmul.mubr.msk.f32.vlgmr.msra.gmra.mxu1 %vm49_vm0, %v881_v21  ;;  %3441 = vmatprep.subr.mxu0 %v3863_v12 }
 0x58c   :  { %3442 = vmatpush3.msra.mxu0 %v3994_v20  ;;  %3449 = vmatpush3.msra.mxu1 %v3956_v14 }
 0x58d   :  { %3443 = vmatprep.subr.mxu0 %v3863_v12  ;;  %3450 = vmatprep.subr.mxu1 %v3863_v12 }
 0x58e   :  { %3444 = vmatpush3.msra.mxu0 %v4018_v24  ;;  %3451 = vmatpush3.msra.mxu1 %v3985_v19 }
 0x58f   :  { %3452 = vmatprep.subr.mxu1 %v3863_v12  ;;  %3456 = vmatprep.mubr.msk.f32.mxu1 %vm3864_vm1, %v3863_v12 }
 0x590   :  { %3453 = vmatpush3.msra.mxu1 %v4009_v23  ;;  %3459 = vmatprep.subr.mxu0 %v3863_v12 }
 0x591   :  { %3454 = vmatprep.subr.mxu1 %v3863_v12 }
 0x592   :  { %3455 = vmatpush3.msra.mxu1 %v4033_v27 }
 0x593   :  { %3470 = vmatprep.subr.mxu1 %v3863_v12 }
 0x647   :  { %v872_v28 = vpop.f32.mrf.mxu0 }
 0x648   :  { %v876_v41 = vadd.f32 %v872_v28, %v4090_v42 }
 0x649   :  { %v3425_v43 = vpop.f32.mrf.mxu0 }
 0x64a   :  { %3695 = vtanh.f32 %v876_v41  ;;  %v3112_v53 = vmul.f32 -1.442695, %v876_v41 }
 0x64b   :  { %v950_v45 = vpop.f32.mrf.mxu1 }
 0x64c   :  { %v954_v47 = vadd.f32 %v950_v45, %v4116_v4 }
 0x64d   :  { %v3436_v49 = vpop.f32.mrf.mxu1 }
 0x64e   :  { %3697 = vtanh.f32 %v954_v47  ;;  %v3113_v55 = vmul.f32 -1.442695, %v954_v47 }
 0x64f   :  { %3699 = vpow2.f32 %v3112_v53 }
 0x650   :  { %3701 = vpow2.f32 %v3113_v55 }
 0x657   :  { %v3696_v51 = vpop.eup %3695 }
 0x658   :  { %964 = vrot.lane.b32.xlu0 %v3696_v51, %s3866_s4 }
 0x65b   :  { %v3698_v32 = vpop.eup %3697 }
 0x65c   :  { %988 = vrot.lane.b32.xlu1 %v3698_v32, %s3866_s4  ;;  %v3700_v25 = vpop.eup %3699 }
 0x65d   :  { %v958_v57 = vadd.f32 1.0, %v3700_v25  ;;  %v3702_v42 = vpop.eup %3701 }
 0x65e   :  { %v982_v59 = vadd.f32 1.0, %v3702_v42 }
 0x65f   :  { %3703 = vrcp.f32 %v958_v57 }
 0x660   :  { %3705 = vrcp.f32 %v982_v59 }
 0x66c   :  { %v3704_v61 = vpop.eup %3703 }
 0x66d   :  { %v3706_v7 = vpop.eup %3705  ;;  %v962_v63 = vmul.f32 %v3704_v61, %v4256_v26 }
 0x66e   :  { %v986_v30 = vmul.f32 %v3706_v7, %v4265_v34 }
 0x6ca   :  { %v965_v4 = vpop.permute.xlu0 %964 }
 0x6cb   :  { %v967_v1 = vmul.f32 %v3704_v61, %v965_v4 }
 0x6cd   :  { %969 = vrot.lane.b32.xlu0 %v967_v1, %s3866_s4 }
 0x6ce   :  { %v989_v9 = vpop.permute.xlu1 %988 }
 0x6cf   :  { %v991_v22 = vmul.f32 %v3706_v7, %v989_v9 }
 0x6d1   :  { %993 = vrot.lane.b32.xlu1 %v991_v22, %s3866_s4 }
 0x73f   :  { %v970_v31 = vpop.permute.xlu0 %969 }
 0x740   :  { %v4259_v35 = vadd.f32 %v970_v31, %v962_v63 }
 0x742   :  { %3707 = vtanh.f32 %v4259_v35  ;;  %v4322_v31 = vsel %vm1003_vm6, %v4259_v35, %v4256_v26 }
 0x743   :  { %v994_v33 = vpop.permute.xlu1 %993 }
 0x744   :  { %v4269_v39 = vadd.f32 %v994_v33, %v986_v30 }
 0x746   :  { %3709 = vtanh.f32 %v4269_v39 }
 0x74f   :  { %v3708_v3 = vpop.eup %3707 }
 0x750   :  { %975 = vrot.lane.b32.xlu0 %v3708_v3, %s3866_s4 }
 0x753   :  { %v3710_v15 = vpop.eup %3709 }
 0x754   :  { %999 = vrot.lane.b32.xlu1 %v3710_v15, %s3866_s4  ;;  %v4331_v15 = vsel %vm1004_vm7, %v4269_v39, %v4265_v34 }
 0x7c2   :  { %v976_v21 = vpop.permute.xlu0 %975 }
 0x7c3   :  { %v978_v28 = vmul.f32 %v3704_v61, %v976_v21 }
 0x7c5   :  { %v4278_v17 = vsel %vm1003_vm6, %v978_v28, %v4212_v5  ;;  %vm2473_vm6 = vcmp.gt.s32.totalorder %v4141_v11, 9 }
 0x7c6   :  { %1012 = vrot.lane.b32.xlu0 %v4278_v17, %s3867_s0  ;;  %v1000_v29 = vpop.permute.xlu1 %999 }
 0x7c7   :  { %v1002_v41 = vmul.f32 %v3706_v7, %v1000_v29 }
 0x7c9   :  { %v4286_v43 = vsel %vm1004_vm7, %v1002_v41, %v4220_v37  ;;  %vm2474_vm7 = vcmp.le.s32.totalorder %v4144_v18, 9 }
 0x7ca   :  { %1090 = vrot.lane.b32.xlu1 %v4286_v43, %s3867_s0 }
 0x838   :  { %v1013_v45 = vpop.permute.xlu0 %1012 }
 0x839   :  { %3446 = vmatmul.mubr.msk.f32.vlgmr.msra.gmra.mxu0 %vm49_vm0, %v1013_v45 }
 0x83a   :  { %3460 = vmatpush3.msra.mxu0 %v3942_v10  ;;  %3467 = vmatprep.mubr.msk.f32.mxu0 %vm3864_vm1, %v3863_v12 }
 0x83b   :  { %3461 = vmatprep.subr.mxu0 %v3863_v12 }
 0x83c   :  { %v1091_v5 = vpop.permute.xlu1 %1090  ;;  %3462 = vmatpush3.msra.mxu0 %v3968_v16 }
 0x83d   :  { %3457 = vmatmul.mubr.msk.f32.vlgmr.msra.gmra.mxu1 %vm49_vm0, %v1091_v5  ;;  %3463 = vmatprep.subr.mxu0 %v3863_v12 }
 0x83e   :  { %3464 = vmatpush3.msra.mxu0 %v3994_v20  ;;  %3471 = vmatpush3.msra.mxu1 %v3956_v14 }
 0x83f   :  { %3465 = vmatprep.subr.mxu0 %v3863_v12  ;;  %3472 = vmatprep.subr.mxu1 %v3863_v12 }
 0x840   :  { %3466 = vmatpush3.msra.mxu0 %v4018_v24  ;;  %3473 = vmatpush3.msra.mxu1 %v3985_v19 }
 0x841   :  { %3474 = vmatprep.subr.mxu1 %v3863_v12  ;;  %3478 = vmatprep.mubr.msk.f32.mxu1 %vm3864_vm1, %v3863_v12 }
 0x842   :  { %3475 = vmatpush3.msra.mxu1 %v4009_v23  ;;  %3481 = vmatprep.subr.mxu0 %v3863_v12 }
 0x843   :  { %3476 = vmatprep.subr.mxu1 %v3863_v12 }
 0x844   :  { %3477 = vmatpush3.msra.mxu1 %v4033_v27 }
 0x845   :  { %3492 = vmatprep.subr.mxu1 %v3863_v12 }
 0x8f9   :  { %v1082_v37 = vpop.f32.mrf.mxu0 }
 0x8fa   :  { %v1086_v47 = vadd.f32 %v1082_v37, %v4086_v38 }
 0x8fb   :  { %v3447_v49 = vpop.f32.mrf.mxu0 }
 0x8fc   :  { %3711 = vtanh.f32 %v1086_v47  ;;  %v3116_v57 = vmul.f32 -1.442695, %v1086_v47 }
 0x8fd   :  { %v1160_v51 = vpop.f32.mrf.mxu1 }
 0x8fe   :  { %v1164_v32 = vadd.f32 %v1160_v51, %v4120_v8 }
 0x8ff   :  { %v3458_v53 = vpop.f32.mrf.mxu1 }
 0x900   :  { %3713 = vtanh.f32 %v1164_v32  ;;  %v3117_v42 = vmul.f32 -1.442695, %v1164_v32 }
 0x901   :  { %3715 = vpow2.f32 %v3116_v57 }
 0x902   :  { %3717 = vpow2.f32 %v3117_v42 }
 0x909   :  { %v3712_v55 = vpop.eup %3711 }
 0x90a   :  { %1174 = vrot.lane.b32.xlu0 %v3712_v55, %s3866_s4 }
 0x90d   :  { %v3714_v25 = vpop.eup %3713 }
 0x90e   :  { %1198 = vrot.lane.b32.xlu1 %v3714_v25, %s3866_s4  ;;  %v3716_v59 = vpop.eup %3715 }
 0x90f   :  { %v1168_v61 = vadd.f32 1.0, %v3716_v59  ;;  %v3718_v38 = vpop.eup %3717 }
 0x910   :  { %v1192_v4 = vadd.f32 1.0, %v3718_v38 }
 0x911   :  { %3719 = vrcp.f32 %v1168_v61 }
 0x912   :  { %3721 = vrcp.f32 %v1192_v4 }
 0x91e   :  { %v3720_v1 = vpop.eup %3719 }
 0x91f   :  { %v3722_v9 = vpop.eup %3721  ;;  %v1172_v30 = vmul.f32 %v3720_v1, %v4322_v31 }
 0x920   :  { %v1196_v21 = vmul.f32 %v3722_v9, %v4331_v15 }
 0x97c   :  { %v1175_v8 = vpop.permute.xlu0 %1174 }
 0x97d   :  { %v1177_v7 = vmul.f32 %v3720_v1, %v1175_v8 }
 0x97f   :  { %1179 = vrot.lane.b32.xlu0 %v1177_v7, %s3866_s4 }
 0x980   :  { %v1199_v22 = vpop.permute.xlu1 %1198 }
 0x981   :  { %v1201_v63 = vmul.f32 %v3722_v9, %v1199_v22 }
 0x983   :  { %1203 = vrot.lane.b32.xlu1 %v1201_v63, %s3866_s4 }
 0x9f1   :  { %v1180_v33 = vpop.permute.xlu0 %1179 }
 0x9f2   :  { %v4325_v3 = vadd.f32 %v1180_v33, %v1172_v30 }
 0x9f4   :  { %3723 = vtanh.f32 %v4325_v3  ;;  %v4388_v63 = vsel %vm1213_vm8, %v4325_v3, %v4322_v31 }
 0x9f5   :  { %v1204_v28 = vpop.permute.xlu1 %1203 }
 0x9f6   :  { %v4335_v29 = vadd.f32 %v1204_v28, %v1196_v21 }
 0x9f8   :  { %3725 = vtanh.f32 %v4335_v29  ;;  %v4397_v28 = vsel %vm1214_vm9, %v4335_v29, %v4331_v15 }
 0xa01   :  { %v3724_v26 = vpop.eup %3723 }
 0xa02   :  { %1185 = vrot.lane.b32.xlu0 %v3724_v26, %s3866_s4 }
 0xa05   :  { %v3726_v35 = vpop.eup %3725 }
 0xa06   :  { %1209 = vrot.lane.b32.xlu1 %v3726_v35, %s3866_s4 }
 0xa74   :  { %v1186_v41 = vpop.permute.xlu0 %1185 }
 0xa75   :  { %v1188_v45 = vmul.f32 %v3720_v1, %v1186_v41 }
 0xa77   :  { %v4344_v34 = vsel %vm1213_vm8, %v1188_v45, %v4278_v17  ;;  %vm2683_vm8 = vcmp.gt.s32.totalorder %v4141_v11, 10 }
 0xa78   :  { %1222 = vrot.lane.b32.xlu0 %v4344_v34, %s3867_s0  ;;  %v1210_v39 = vpop.permute.xlu1 %1209 }
 0xa79   :  { %v1212_v5 = vmul.f32 %v3722_v9, %v1210_v39 }
 0xa7b   :  { %v4352_v37 = vsel %vm1214_vm9, %v1212_v5, %v4286_v43  ;;  %vm2684_vm9 = vcmp.le.s32.totalorder %v4144_v18, 10 }
 0xa7c   :  { %1300 = vrot.lane.b32.xlu1 %v4352_v37, %s3867_s0 }
 0xaea   :  { %v1223_v47 = vpop.permute.xlu0 %1222 }
 0xaeb   :  { %3468 = vmatmul.mubr.msk.f32.vlgmr.msra.gmra.mxu0 %vm49_vm0, %v1223_v47 }
 0xaec   :  { %3482 = vmatpush3.msra.mxu0 %v3942_v10  ;;  %3489 = vmatprep.mubr.msk.f32.mxu0 %vm3864_vm1, %v3863_v12 }
 0xaed   :  { %3483 = vmatprep.subr.mxu0 %v3863_v12 }
 0xaee   :  { %v1301_v17 = vpop.permute.xlu1 %1300  ;;  %3484 = vmatpush3.msra.mxu0 %v3968_v16 }
 0xaef   :  { %3479 = vmatmul.mubr.msk.f32.vlgmr.msra.gmra.mxu1 %vm49_vm0, %v1301_v17  ;;  %3485 = vmatprep.subr.mxu0 %v3863_v12 }
 0xaf0   :  { %3486 = vmatpush3.msra.mxu0 %v3994_v20  ;;  %3493 = vmatpush3.msra.mxu1 %v3956_v14 }
 0xaf1   :  { %3487 = vmatprep.subr.mxu0 %v3863_v12  ;;  %3494 = vmatprep.subr.mxu1 %v3863_v12 }
 0xaf2   :  { %3488 = vmatpush3.msra.mxu0 %v4018_v24  ;;  %3495 = vmatpush3.msra.mxu1 %v3985_v19 }
 0xaf3   :  { %3496 = vmatprep.subr.mxu1 %v3863_v12  ;;  %3500 = vmatprep.mubr.msk.f32.mxu1 %vm3864_vm1, %v3863_v12 }
 0xaf4   :  { %3497 = vmatpush3.msra.mxu1 %v4009_v23  ;;  %3503 = vmatprep.subr.mxu0 %v3863_v12 }
 0xaf5   :  { %3498 = vmatprep.subr.mxu1 %v3863_v12 }
 0xaf6   :  { %3499 = vmatpush3.msra.mxu1 %v4033_v27 }
 0xaf7   :  { %3514 = vmatprep.subr.mxu1 %v3863_v12 }
 0xbab   :  { %v1292_v43 = vpop.f32.mrf.mxu0 }
 0xbac   :  { %v1296_v49 = vadd.f32 %v1292_v43, %v4098_v50 }
 0xbad   :  { %v3469_v51 = vpop.f32.mrf.mxu0 }
 0xbae   :  { %3727 = vtanh.f32 %v1296_v49  ;;  %v3120_v42 = vmul.f32 -1.442695, %v1296_v49 }
 0xbaf   :  { %v1370_v32 = vpop.f32.mrf.mxu1 }
 0xbb0   :  { %v1374_v53 = vadd.f32 %v1370_v32, %v4108_v60 }
 0xbb1   :  { %v3480_v55 = vpop.f32.mrf.mxu1 }
 0xbb2   :  { %3729 = vtanh.f32 %v1374_v53  ;;  %v3121_v59 = vmul.f32 -1.442695, %v1374_v53 }
 0xbb3   :  { %3731 = vpow2.f32 %v3120_v42 }
 0xbb4   :  { %3733 = vpow2.f32 %v3121_v59 }
 0xbbb   :  { %v3728_v25 = vpop.eup %3727 }
 0xbbc   :  { %1384 = vrot.lane.b32.xlu0 %v3728_v25, %s3866_s4 }
 0xbbf   :  { %v3730_v57 = vpop.eup %3729 }
 0xbc0   :  { %1408 = vrot.lane.b32.xlu1 %v3730_v57, %s3866_s4  ;;  %v3732_v61 = vpop.eup %3731 }
 0xbc1   :  { %v1378_v38 = vadd.f32 1.0, %v3732_v61  ;;  %v3734_v50 = vpop.eup %3733 }
 0xbc2   :  { %v1402_v4 = vadd.f32 1.0, %v3734_v50 }
 0xbc3   :  { %3735 = vrcp.f32 %v1378_v38 }
 0xbc4   :  { %3737 = vrcp.f32 %v1402_v4 }
 0xbd0   :  { %v3736_v1 = vpop.eup %3735 }
 0xbd1   :  { %v3738_v7 = vpop.eup %3737  ;;  %v1382_v30 = vmul.f32 %v3736_v1, %v4388_v63 }
 0xbd2   :  { %v1406_v26 = vmul.f32 %v3738_v7, %v4397_v28 }
 0xc2e   :  { %v1385_v60 = vpop.permute.xlu0 %1384 }
 0xc2f   :  { %v1387_v8 = vmul.f32 %v3736_v1, %v1385_v60 }
 0xc31   :  { %1389 = vrot.lane.b32.xlu0 %v1387_v8, %s3866_s4 }
 0xc32   :  { %v1409_v9 = vpop.permute.xlu1 %1408 }
 0xc33   :  { %v1411_v22 = vmul.f32 %v3738_v7, %v1409_v9 }
 0xc35   :  { %1413 = vrot.lane.b32.xlu1 %v1411_v22, %s3866_s4 }
 0xca3   :  { %v1390_v33 = vpop.permute.xlu0 %1389 }
 0xca4   :  { %v4391_v21 = vadd.f32 %v1390_v33, %v1382_v30 }
 0xca6   :  { %3739 = vtanh.f32 %v4391_v21  ;;  %v4454_v59 = vsel %vm1423_vm10, %v4391_v21, %v4388_v63 }
 0xca7   :  { %v1414_v35 = vpop.permute.xlu1 %1413 }
 0xca8   :  { %v4401_v41 = vadd.f32 %v1414_v35, %v1406_v26  ;;  %v4492_v35 = vld [vmem:[%s4910_s3 + $0x18] sm:$0xff] }
 0xcaa   :  { %3741 = vtanh.f32 %v4401_v41  ;;  %v4463_v4 = vsel %vm1424_vm11, %v4401_v41, %v4397_v28 }
 0xcb3   :  { %v3740_v31 = vpop.eup %3739 }
 0xcb4   :  { %1395 = vrot.lane.b32.xlu0 %v3740_v31, %s3866_s4  ;;  %v4501_v31 = vld [vmem:[%s4910_s3 + $0x10] sm:$0xff] }
 0xcb7   :  { %v3742_v3 = vpop.eup %3741 }
 0xcb8   :  { %1419 = vrot.lane.b32.xlu1 %v3742_v3, %s3866_s4  ;;  %v4509_v3 = vld [vmem:[%s4910_s3 + $0x8] sm:$0xff] }
 0xd26   :  { %v1396_v45 = vpop.permute.xlu0 %1395 }
 0xd27   :  { %v1398_v39 = vmul.f32 %v3736_v1, %v1396_v45  ;;  %v4515_v45 = vld [vmem:[%s4910_s3 + $0x38] sm:$0xff] }
 0xd29   :  { %v4410_v15 = vsel %vm1423_vm10, %v1398_v39, %v4344_v34  ;;  %v4523_v39 = vld [vmem:[%s4910_s3] sm:$0xff]  ;;  %vm2893_vm10 = vcmp.le.s32.totalorder %v4144_v18, 11 }
 0xd2a   :  { %1432 = vrot.lane.b32.xlu0 %v4410_v15, %s3867_s0  ;;  %v1420_v29 = vpop.permute.xlu1 %1419 }
 0xd2b   :  { %v1422_v5 = vmul.f32 %v3738_v7, %v1420_v29  ;;  %v4538_v29 = vld [vmem:[%s4910_s3 + $0x28] sm:$0xff] }
 0xd2d   :  { %v4418_v47 = vsel %vm1424_vm11, %v1422_v5, %v4352_v37  ;;  %v4546_v5 = vld [vmem:[%s4910_s3 + $0x20] sm:$0xff]  ;;  %vm3063_vm11 = vcmask 31744  }
 0xd2e   :  { %1510 = vrot.lane.b32.xlu1 %v4418_v47, %s3867_s0 }
 0xd9c   :  { %v1433_v17 = vpop.permute.xlu0 %1432 }
 0xd9d   :  { %3490 = vmatmul.mubr.msk.f32.vlgmr.msra.gmra.mxu0 %vm49_vm0, %v1433_v17 }
 0xd9e   :  { %3504 = vmatpush3.msra.mxu0 %v3942_v10  ;;  %3511 = vmatprep.mubr.msk.f32.mxu0 %vm3864_vm1, %v3863_v12 }
 0xd9f   :  { %3505 = vmatprep.subr.mxu0 %v3863_v12 }
 0xda0   :  { %v1511_v34 = vpop.permute.xlu1 %1510  ;;  %3506 = vmatpush3.msra.mxu0 %v3968_v16 }
 0xda1   :  { %3501 = vmatmul.mubr.msk.f32.vlgmr.msra.gmra.mxu1 %vm49_vm0, %v1511_v34  ;;  %3507 = vmatprep.subr.mxu0 %v3863_v12 }
 0xda2   :  { %3508 = vmatpush3.msra.mxu0 %v3994_v20  ;;  %3515 = vmatpush3.msra.mxu1 %v3956_v14 }
 0xda3   :  { %3509 = vmatprep.subr.mxu0 %v3863_v12  ;;  %3516 = vmatprep.subr.mxu1 %v3863_v12 }
 0xda4   :  { %3510 = vmatpush3.msra.mxu0 %v4018_v24  ;;  %3517 = vmatpush3.msra.mxu1 %v3985_v19 }
 0xda5   :  { %3518 = vmatprep.subr.mxu1 %v3863_v12  ;;  %3522 = vmatprep.mubr.msk.f32.mxu1 %vm3864_vm1, %v3863_v12 }
 0xda6   :  { %3519 = vmatpush3.msra.mxu1 %v4009_v23  ;;  %3525 = vmatprep.subr.mxu0 %v3863_v12 }
 0xda7   :  { %3520 = vmatprep.subr.mxu1 %v3863_v12 }
 0xda8   :  { %3521 = vmatpush3.msra.mxu1 %v4033_v27 }
 0xda9   :  { %3536 = vmatprep.subr.mxu1 %v3863_v12 }
 0xe5d   :  { %v1502_v10 = vpop.f32.mrf.mxu0 }
 0xe5e   :  { %v1506_v14 = vadd.f32 %v1502_v10, %v4094_v46 }
 0xe5f   :  { %v3491_v16 = vpop.f32.mrf.mxu0 }
 0xe60   :  { %3743 = vtanh.f32 %v1506_v14  ;;  %v3124_v43 = vmul.f32 -1.442695, %v1506_v14 }
 0xe61   :  { %v1580_v19 = vpop.f32.mrf.mxu1 }
 0xe62   :  { %v1584_v20 = vadd.f32 %v1580_v19, %v4112_v0 }
 0xe63   :  { %v3502_v24 = vpop.f32.mrf.mxu1 }
 0xe64   :  { %3745 = vtanh.f32 %v1584_v20  ;;  %v3125_v27 = vmul.f32 -1.442695, %v1584_v20 }
 0xe65   :  { %3747 = vpow2.f32 %v3124_v43 }
 0xe66   :  { %3749 = vpow2.f32 %v3125_v27 }
 0xe6d   :  { %v3744_v37 = vpop.eup %3743 }
 0xe6e   :  { %1594 = vrot.lane.b32.xlu0 %v3744_v37, %s3866_s4 }
 0xe71   :  { %v3746_v23 = vpop.eup %3745 }
 0xe72   :  { %1618 = vrot.lane.b32.xlu1 %v3746_v23, %s3866_s4  ;;  %v3748_v49 = vpop.eup %3747 }
 0xe73   :  { %v1588_v51 = vadd.f32 1.0, %v3748_v49  ;;  %v3750_v46 = vpop.eup %3749 }
 0xe74   :  { %v1612_v32 = vadd.f32 1.0, %v3750_v46 }
 0xe75   :  { %3751 = vrcp.f32 %v1588_v51 }
 0xe76   :  { %3753 = vrcp.f32 %v1612_v32 }
 0xe82   :  { %v3752_v53 = vpop.eup %3751 }
 0xe83   :  { %v3754_v25 = vpop.eup %3753  ;;  %v1592_v61 = vmul.f32 %v3752_v53, %v4454_v59 }
 0xe84   :  { %v1616_v1 = vmul.f32 %v3754_v25, %v4463_v4 }
 0xee0   :  { %v1595_v0 = vpop.permute.xlu0 %1594 }
 0xee1   :  { %v1597_v55 = vmul.f32 %v3752_v53, %v1595_v0 }
 0xee3   :  { %1599 = vrot.lane.b32.xlu0 %v1597_v55, %s3866_s4 }
 0xee4   :  { %v1619_v57 = vpop.permute.xlu1 %1618 }
 0xee5   :  { %v1621_v42 = vmul.f32 %v3754_v25, %v1619_v57 }
 0xee7   :  { %1623 = vrot.lane.b32.xlu1 %v1621_v42, %s3866_s4 }
 0xf55   :  { %v1600_v38 = vpop.permute.xlu0 %1599 }
 0xf56   :  { %v4457_v50 = vadd.f32 %v1600_v38, %v1592_v61 }
 0xf58   :  { %3755 = vtanh.f32 %v4457_v50  ;;  %v4560_v0 = vsel %vm1633_vm12, %v4457_v50, %v4454_v59 }
 0xf59   :  { %v1624_v60 = vpop.permute.xlu1 %1623 }
 0xf5a   :  { %v4467_v8 = vadd.f32 %v1624_v60, %v1616_v1 }
 0xf5c   :  { %3757 = vtanh.f32 %v4467_v8  ;;  %v4569_v42 = vsel %vm1634_vm13, %v4467_v8, %v4463_v4 }
 0xf65   :  { %v3756_v7 = vpop.eup %3755 }
 0xf66   :  { %1605 = vrot.lane.b32.xlu0 %v3756_v7, %s3866_s4 }
 0xf69   :  { %v3758_v9 = vpop.eup %3757 }
 0xf6a   :  { %1629 = vrot.lane.b32.xlu1 %v3758_v9, %s3866_s4 }
 0xfd8   :  { %v1606_v22 = vpop.permute.xlu0 %1605 }
 0xfd9   :  { %v1608_v63 = vmul.f32 %v3752_v53, %v1606_v22 }
 0xfdb   :  { %v4476_v30 = vsel %vm1633_vm12, %v1608_v63, %v4410_v15  ;;  %v4529_v15 = vld [vmem:[%s4910_s3 + $0x30] sm:$0xff] }
 0xfdc   :  { %1642 = vrot.lane.b32.xlu0 %v4476_v30, %s3867_s0  ;;  %v1630_v33 = vpop.permute.xlu1 %1629 }
 0xfdd   :  { %v1632_v21 = vmul.f32 %v3754_v25, %v1630_v33 }
 0xfdf   :  { %v4484_v28 = vsel %vm1634_vm13, %v1632_v21, %v4418_v47 }
 0xfe0   :  { %1720 = vrot.lane.b32.xlu1 %v4484_v28, %s3867_s0 }
0x104e   :  { %v1643_v26 = vpop.permute.xlu0 %1642 }
0x104f   :  { %3512 = vmatmul.mubr.msk.f32.vlgmr.msra.gmra.mxu0 %vm49_vm0, %v1643_v26 }
0x1050   :  { %3526 = vmatpush3.msra.mxu0 %v4492_v35  ;;  %3533 = vmatprep.mubr.msk.f32.mxu0 %vm3864_vm1, %v3863_v12 }
0x1051   :  { %3527 = vmatprep.subr.mxu0 %v3863_v12 }
0x1052   :  { %v1721_v41 = vpop.permute.xlu1 %1720  ;;  %3528 = vmatpush3.msra.mxu0 %v4501_v31 }
0x1053   :  { %3523 = vmatmul.mubr.msk.f32.vlgmr.msra.gmra.mxu1 %vm49_vm0, %v1721_v41  ;;  %3529 = vmatprep.subr.mxu0 %v3863_v12 }
0x1054   :  { %3530 = vmatpush3.msra.mxu0 %v4509_v3  ;;  %3537 = vmatpush3.msra.mxu1 %v4515_v45 }
0x1055   :  { %3531 = vmatprep.subr.mxu0 %v3863_v12  ;;  %3538 = vmatprep.subr.mxu1 %v3863_v12 }
0x1056   :  { %3532 = vmatpush3.msra.mxu0 %v4523_v39  ;;  %3539 = vmatpush3.msra.mxu1 %v4529_v15 }
0x1057   :  { %3540 = vmatprep.subr.mxu1 %v3863_v12  ;;  %3544 = vmatprep.mubr.msk.f32.mxu1 %vm3864_vm1, %v3863_v12 }
0x1058   :  { %3541 = vmatpush3.msra.mxu1 %v4538_v29  ;;  %3547 = vmatprep.subr.mxu0 %v3863_v12 }
0x1059   :  { %3542 = vmatprep.subr.mxu1 %v3863_v12 }
0x105a   :  { %3543 = vmatpush3.msra.mxu1 %v4546_v5 }
0x105b   :  { %3558 = vmatprep.subr.mxu1 %v3863_v12 }
0x110f   :  { %v1712_v47 = vpop.f32.mrf.mxu0 }
0x1110   :  { %v1716_v17 = vadd.f32 %v1712_v47, %v4106_v58 }
0x1111   :  { %v3513_v34 = vpop.f32.mrf.mxu0 }
0x1112   :  { %3759 = vtanh.f32 %v1716_v17  ;;  %v3128_v24 = vmul.f32 -1.442695, %v1716_v17 }
0x1113   :  { %v1790_v10 = vpop.f32.mrf.mxu1 }
0x1114   :  { %v1794_v14 = vadd.f32 %v1790_v10, %v4100_v52 }
0x1115   :  { %v3524_v16 = vpop.f32.mrf.mxu1 }
0x1116   :  { %3761 = vtanh.f32 %v1794_v14  ;;  %v3129_v37 = vmul.f32 -1.442695, %v1794_v14 }
0x1117   :  { %3763 = vpow2.f32 %v3128_v24 }
0x1118   :  { %3765 = vpow2.f32 %v3129_v37 }
0x111f   :  { %v3760_v19 = vpop.eup %3759 }
0x1120   :  { %1804 = vrot.lane.b32.xlu0 %v3760_v19, %s3866_s4 }
0x1123   :  { %v3762_v20 = vpop.eup %3761 }
0x1124   :  { %1828 = vrot.lane.b32.xlu1 %v3762_v20, %s3866_s4  ;;  %v3764_v23 = vpop.eup %3763 }
0x1125   :  { %v1798_v43 = vadd.f32 1.0, %v3764_v23  ;;  %v3766_v58 = vpop.eup %3765 }
0x1126   :  { %v1822_v27 = vadd.f32 1.0, %v3766_v58 }
0x1127   :  { %3767 = vrcp.f32 %v1798_v43 }
0x1128   :  { %3769 = vrcp.f32 %v1822_v27 }
0x1134   :  { %v3768_v49 = vpop.eup %3767 }
0x1135   :  { %v3770_v46 = vpop.eup %3769  ;;  %v1802_v55 = vmul.f32 %v3768_v49, %v4560_v0 }
0x1136   :  { %v1826_v61 = vmul.f32 %v3770_v46, %v4569_v42 }
0x1192   :  { %v1805_v52 = vpop.permute.xlu0 %1804 }
0x1193   :  { %v1807_v51 = vmul.f32 %v3768_v49, %v1805_v52 }
0x1195   :  { %1809 = vrot.lane.b32.xlu0 %v1807_v51, %s3866_s4 }
0x1196   :  { %v1829_v32 = vpop.permute.xlu1 %1828 }
0x1197   :  { %v1831_v53 = vmul.f32 %v3770_v46, %v1829_v32 }
0x1199   :  { %1833 = vrot.lane.b32.xlu1 %v1831_v53, %s3866_s4 }
0x1207   :  { %v1810_v25 = vpop.permute.xlu0 %1809 }
0x1208   :  { %v4563_v57 = vadd.f32 %v1810_v25, %v1802_v55 }
0x120a   :  { %3771 = vtanh.f32 %v4563_v57  ;;  %v4626_v27 = vsel %vm1843_vm14, %v4563_v57, %v4560_v0 }
0x120b   :  { %v1834_v38 = vpop.permute.xlu1 %1833 }
0x120c   :  { %v4573_v1 = vadd.f32 %v1834_v38, %v1826_v61 }
0x120e   :  { %3773 = vtanh.f32 %v4573_v1 }
0x1217   :  { %v3772_v59 = vpop.eup %3771 }
0x1218   :  { %1815 = vrot.lane.b32.xlu0 %v3772_v59, %s3866_s4 }
0x121b   :  { %v3774_v50 = vpop.eup %3773 }
0x121c   :  { %1839 = vrot.lane.b32.xlu1 %v3774_v50, %s3866_s4 }
0x128a   :  { %v1816_v60 = vpop.permute.xlu0 %1815 }
0x128b   :  { %v1818_v7 = vmul.f32 %v3768_v49, %v1816_v60 }
0x128d   :  { %v4582_v4 = vsel %vm1843_vm14, %v1818_v7, %v4476_v30 }
0x128e   :  { %1852 = vrot.lane.b32.xlu0 %v4582_v4, %s3867_s0  ;;  %v1840_v8 = vpop.permute.xlu1 %1839 }
0x128f   :  { %v1842_v9 = vmul.f32 %v3770_v46, %v1840_v8  ;;  %v4635_v46 = vsel %vm1844_vm15, %v4573_v1, %v4569_v42 }
0x1291   :  { %v4590_v22 = vsel %vm1844_vm15, %v1842_v9, %v4484_v28 }
0x1292   :  { %1930 = vrot.lane.b32.xlu1 %v4590_v22, %s3867_s0 }
0x1300   :  { %v1853_v63 = vpop.permute.xlu0 %1852 }
0x1301   :  { %3534 = vmatmul.mubr.msk.f32.vlgmr.msra.gmra.mxu0 %vm49_vm0, %v1853_v63 }
0x1302   :  { %3548 = vmatpush3.msra.mxu0 %v4492_v35  ;;  %3555 = vmatprep.mubr.msk.f32.mxu0 %vm3864_vm1, %v3863_v12 }
0x1303   :  { %3549 = vmatprep.subr.mxu0 %v3863_v12 }
0x1304   :  { %v1931_v30 = vpop.permute.xlu1 %1930  ;;  %3550 = vmatpush3.msra.mxu0 %v4501_v31 }
0x1305   :  { %3545 = vmatmul.mubr.msk.f32.vlgmr.msra.gmra.mxu1 %vm49_vm0, %v1931_v30  ;;  %3551 = vmatprep.subr.mxu0 %v3863_v12 }
0x1306   :  { %3552 = vmatpush3.msra.mxu0 %v4509_v3  ;;  %3559 = vmatpush3.msra.mxu1 %v4515_v45 }
0x1307   :  { %3553 = vmatprep.subr.mxu0 %v3863_v12  ;;  %3560 = vmatprep.subr.mxu1 %v3863_v12 }
0x1308   :  { %3554 = vmatpush3.msra.mxu0 %v4523_v39  ;;  %3561 = vmatpush3.msra.mxu1 %v4529_v15 }
0x1309   :  { %3562 = vmatprep.subr.mxu1 %v3863_v12  ;;  %3566 = vmatprep.mubr.msk.f32.mxu1 %vm3864_vm1, %v3863_v12 }
0x130a   :  { %3563 = vmatpush3.msra.mxu1 %v4538_v29  ;;  %3569 = vmatprep.subr.mxu0 %v3863_v12 }
0x130b   :  { %3564 = vmatprep.subr.mxu1 %v3863_v12 }
0x130c   :  { %3565 = vmatpush3.msra.mxu1 %v4546_v5 }
0x130d   :  { %3580 = vmatprep.subr.mxu1 %v3863_v12 }
0x13c1   :  { %v1922_v33 = vpop.f32.mrf.mxu0 }
0x13c2   :  { %v1926_v21 = vadd.f32 %v1922_v33, %v4102_v54 }
0x13c3   :  { %v3535_v28 = vpop.f32.mrf.mxu0 }
0x13c4   :  { %3775 = vtanh.f32 %v1926_v21  ;;  %v3132_v10 = vmul.f32 -1.442695, %v1926_v21 }
0x13c5   :  { %v2000_v26 = vpop.f32.mrf.mxu1 }
0x13c6   :  { %v2004_v41 = vadd.f32 %v2000_v26, %v4104_v56 }
0x13c7   :  { %v3546_v47 = vpop.f32.mrf.mxu1 }
0x13c8   :  { %3777 = vtanh.f32 %v2004_v41  ;;  %v3133_v14 = vmul.f32 -1.442695, %v2004_v41 }
0x13c9   :  { %3779 = vpow2.f32 %v3132_v10 }
0x13ca   :  { %3781 = vpow2.f32 %v3133_v14 }
0x13d1   :  { %v3776_v17 = vpop.eup %3775 }
0x13d2   :  { %2014 = vrot.lane.b32.xlu0 %v3776_v17, %s3866_s4 }
0x13d5   :  { %v3778_v34 = vpop.eup %3777 }
0x13d6   :  { %2038 = vrot.lane.b32.xlu1 %v3778_v34, %s3866_s4  ;;  %v3780_v16 = vpop.eup %3779 }
0x13d7   :  { %v2008_v19 = vadd.f32 1.0, %v3780_v16  ;;  %v3782_v54 = vpop.eup %3781 }
0x13d8   :  { %v2032_v20 = vadd.f32 1.0, %v3782_v54 }
0x13d9   :  { %3783 = vrcp.f32 %v2008_v19 }
0x13da   :  { %3785 = vrcp.f32 %v2032_v20 }
0x13e6   :  { %v3784_v24 = vpop.eup %3783 }
0x13e7   :  { %v3786_v23 = vpop.eup %3785  ;;  %v2012_v49 = vmul.f32 %v3784_v24, %v4626_v27 }
0x13e8   :  { %v2036_v32 = vmul.f32 %v3786_v23, %v4635_v46 }
0x1444   :  { %v2015_v56 = vpop.permute.xlu0 %2014 }
0x1445   :  { %v2017_v37 = vmul.f32 %v3784_v24, %v2015_v56 }
0x1447   :  { %2019 = vrot.lane.b32.xlu0 %v2017_v37, %s3866_s4 }
0x1448   :  { %v2039_v43 = vpop.permute.xlu1 %2038 }
0x1449   :  { %v2041_v58 = vmul.f32 %v3786_v23, %v2039_v43 }
0x144b   :  { %2043 = vrot.lane.b32.xlu1 %v2041_v58, %s3866_s4 }
0x14b9   :  { %v2020_v52 = vpop.permute.xlu0 %2019 }
0x14ba   :  { %v4629_v51 = vadd.f32 %v2020_v52, %v2012_v49 }
0x14bc   :  { %3787 = vtanh.f32 %v4629_v51  ;;  %v4692_v19 = vsel %vm2053_vm2, %v4629_v51, %v4626_v27 }
0x14bd   :  { %v2044_v53 = vpop.permute.xlu1 %2043 }
0x14be   :  { %v4639_v55 = vadd.f32 %v2044_v53, %v2036_v32 }
0x14c0   :  { %3789 = vtanh.f32 %v4639_v55  ;;  %v4701_v56 = vsel %vm2054_vm3, %v4639_v55, %v4635_v46 }
0x14c9   :  { %v3788_v0 = vpop.eup %3787 }
0x14ca   :  { %2025 = vrot.lane.b32.xlu0 %v3788_v0, %s3866_s4 }
0x14cd   :  { %v3790_v25 = vpop.eup %3789 }
0x14ce   :  { %2049 = vrot.lane.b32.xlu1 %v3790_v25, %s3866_s4 }
0x153c   :  { %v2026_v57 = vpop.permute.xlu0 %2025 }
0x153d   :  { %v2028_v61 = vmul.f32 %v3784_v24, %v2026_v57 }
0x153f   :  { %v4648_v42 = vsel %vm2053_vm2, %v2028_v61, %v4582_v4 }
0x1540   :  { %2062 = vrot.lane.b32.xlu0 %v4648_v42, %s3867_s0  ;;  %v2050_v38 = vpop.permute.xlu1 %2049 }
0x1541   :  { %v2052_v1 = vmul.f32 %v3786_v23, %v2050_v38 }
0x1543   :  { %v4656_v59 = vsel %vm2054_vm3, %v2052_v1, %v4590_v22 }
0x1544   :  { %2140 = vrot.lane.b32.xlu1 %v4656_v59, %s3867_s0 }
0x15b2   :  { %v2063_v50 = vpop.permute.xlu0 %2062 }
0x15b3   :  { %3556 = vmatmul.mubr.msk.f32.vlgmr.msra.gmra.mxu0 %vm49_vm0, %v2063_v50 }
0x15b4   :  { %3570 = vmatpush3.msra.mxu0 %v4492_v35  ;;  %3577 = vmatprep.mubr.msk.f32.mxu0 %vm3864_vm1, %v3863_v12 }
0x15b5   :  { %3571 = vmatprep.subr.mxu0 %v3863_v12 }
0x15b6   :  { %v2141_v60 = vpop.permute.xlu1 %2140  ;;  %3572 = vmatpush3.msra.mxu0 %v4501_v31 }
0x15b7   :  { %3567 = vmatmul.mubr.msk.f32.vlgmr.msra.gmra.mxu1 %vm49_vm0, %v2141_v60  ;;  %3573 = vmatprep.subr.mxu0 %v3863_v12 }
0x15b8   :  { %3574 = vmatpush3.msra.mxu0 %v4509_v3  ;;  %3581 = vmatpush3.msra.mxu1 %v4515_v45 }
0x15b9   :  { %3575 = vmatprep.subr.mxu0 %v3863_v12  ;;  %3582 = vmatprep.subr.mxu1 %v3863_v12 }
0x15ba   :  { %3576 = vmatpush3.msra.mxu0 %v4523_v39  ;;  %3583 = vmatpush3.msra.mxu1 %v4529_v15 }
0x15bb   :  { %3584 = vmatprep.subr.mxu1 %v3863_v12  ;;  %3588 = vmatprep.mubr.msk.f32.mxu1 %vm3864_vm1, %v3863_v12 }
0x15bc   :  { %3585 = vmatpush3.msra.mxu1 %v4538_v29  ;;  %3591 = vmatprep.subr.mxu0 %v3863_v12 }
0x15bd   :  { %3586 = vmatprep.subr.mxu1 %v3863_v12 }
0x15be   :  { %3587 = vmatpush3.msra.mxu1 %v4546_v5 }
0x15bf   :  { %3602 = vmatprep.subr.mxu1 %v3863_v12 }
0x1673   :  { %v2132_v7 = vpop.f32.mrf.mxu0 }
0x1674   :  { %v2136_v4 = vadd.f32 %v2132_v7, %v4114_v2 }
0x1675   :  { %v3557_v8 = vpop.f32.mrf.mxu0 }
0x1676   :  { %3791 = vtanh.f32 %v2136_v4  ;;  %v3136_v21 = vmul.f32 -1.442695, %v2136_v4 }
0x1677   :  { %v2210_v9 = vpop.f32.mrf.mxu1 }
0x1678   :  { %v2214_v22 = vadd.f32 %v2210_v9, %v4092_v44 }
0x1679   :  { %v3568_v63 = vpop.f32.mrf.mxu1 }
0x167a   :  { %3793 = vtanh.f32 %v2214_v22  ;;  %v3137_v28 = vmul.f32 -1.442695, %v2214_v22 }
0x167b   :  { %3795 = vpow2.f32 %v3136_v21 }
0x167c   :  { %3797 = vpow2.f32 %v3137_v28 }
0x1683   :  { %v3792_v30 = vpop.eup %3791 }
0x1684   :  { %2224 = vrot.lane.b32.xlu0 %v3792_v30, %s3866_s4 }
0x1687   :  { %v3794_v33 = vpop.eup %3793 }
0x1688   :  { %2248 = vrot.lane.b32.xlu1 %v3794_v33, %s3866_s4  ;;  %v3796_v26 = vpop.eup %3795 }
0x1689   :  { %v2218_v41 = vadd.f32 1.0, %v3796_v26  ;;  %v3798_v2 = vpop.eup %3797 }
0x168a   :  { %v2242_v47 = vadd.f32 1.0, %v3798_v2 }
0x168b   :  { %3799 = vrcp.f32 %v2218_v41 }
0x168c   :  { %3801 = vrcp.f32 %v2242_v47 }
0x1698   :  { %v3800_v17 = vpop.eup %3799 }
0x1699   :  { %v3802_v10 = vpop.eup %3801  ;;  %v2222_v54 = vmul.f32 %v3800_v17, %v4692_v19 }
0x169a   :  { %v2246_v37 = vmul.f32 %v3802_v10, %v4701_v56 }
0x16f6   :  { %v2225_v44 = vpop.permute.xlu0 %2224 }
0x16f7   :  { %v2227_v34 = vmul.f32 %v3800_v17, %v2225_v44 }
0x16f9   :  { %2229 = vrot.lane.b32.xlu0 %v2227_v34, %s3866_s4 }
0x16fa   :  { %v2249_v14 = vpop.permute.xlu1 %2248 }
0x16fb   :  { %v2251_v16 = vmul.f32 %v3802_v10, %v2249_v14 }
0x16fd   :  { %2253 = vrot.lane.b32.xlu1 %v2251_v16, %s3866_s4 }
0x176b   :  { %v2230_v20 = vpop.permute.xlu0 %2229 }
0x176c   :  { %v4695_v24 = vadd.f32 %v2230_v20, %v2222_v54 }
0x176e   :  { %3803 = vtanh.f32 %v4695_v24  ;;  %v4758_v28 = vsel %vm2263_vm4, %v4695_v24, %v4692_v19 }
0x176f   :  { %v2254_v23 = vpop.permute.xlu1 %2253 }
0x1770   :  { %v4705_v43 = vadd.f32 %v2254_v23, %v2246_v37 }
0x1772   :  { %3805 = vtanh.f32 %v4705_v43  ;;  %v4767_v47 = vsel %vm2264_vm5, %v4705_v43, %v4701_v56 }
0x177b   :  { %v3804_v58 = vpop.eup %3803 }
0x177c   :  { %2235 = vrot.lane.b32.xlu0 %v3804_v58, %s3866_s4 }
0x177f   :  { %v3806_v27 = vpop.eup %3805 }
0x1780   :  { %2259 = vrot.lane.b32.xlu1 %v3806_v27, %s3866_s4 }
0x17ee   :  { %v2236_v49 = vpop.permute.xlu0 %2235 }
0x17ef   :  { %v2238_v52 = vmul.f32 %v3800_v17, %v2236_v49 }
0x17f1   :  { %v4714_v51 = vsel %vm2263_vm4, %v2238_v52, %v4648_v42 }
0x17f2   :  { %2272 = vrot.lane.b32.xlu0 %v4714_v51, %s3867_s0  ;;  %v2260_v46 = vpop.permute.xlu1 %2259 }
0x17f3   :  { %v2262_v32 = vmul.f32 %v3802_v10, %v2260_v46 }
0x17f5   :  { %v4722_v53 = vsel %vm2264_vm5, %v2262_v32, %v4656_v59 }
0x17f6   :  { %2350 = vrot.lane.b32.xlu1 %v4722_v53, %s3867_s0 }
0x1864   :  { %v2273_v55 = vpop.permute.xlu0 %2272 }
0x1865   :  { %3578 = vmatmul.mubr.msk.f32.vlgmr.msra.gmra.mxu0 %vm49_vm0, %v2273_v55 }
0x1866   :  { %3592 = vmatpush3.msra.mxu0 %v4492_v35  ;;  %3599 = vmatprep.mubr.msk.f32.mxu0 %vm3864_vm1, %v3863_v12 }
0x1867   :  { %3593 = vmatprep.subr.mxu0 %v3863_v12 }
0x1868   :  { %v2351_v0 = vpop.permute.xlu1 %2350  ;;  %3594 = vmatpush3.msra.mxu0 %v4501_v31 }
0x1869   :  { %3589 = vmatmul.mubr.msk.f32.vlgmr.msra.gmra.mxu1 %vm49_vm0, %v2351_v0  ;;  %3595 = vmatprep.subr.mxu0 %v3863_v12 }
0x186a   :  { %3596 = vmatpush3.msra.mxu0 %v4509_v3  ;;  %3603 = vmatpush3.msra.mxu1 %v4515_v45 }
0x186b   :  { %3597 = vmatprep.subr.mxu0 %v3863_v12  ;;  %3604 = vmatprep.subr.mxu1 %v3863_v12 }
0x186c   :  { %3598 = vmatpush3.msra.mxu0 %v4523_v39  ;;  %3605 = vmatpush3.msra.mxu1 %v4529_v15 }
0x186d   :  { %3606 = vmatprep.subr.mxu1 %v3863_v12  ;;  %3610 = vmatprep.mubr.msk.f32.mxu1 %vm3864_vm1, %v3863_v12 }
0x186e   :  { %3607 = vmatpush3.msra.mxu1 %v4538_v29  ;;  %3613 = vmatprep.subr.mxu0 %v3863_v12 }
0x186f   :  { %3608 = vmatprep.subr.mxu1 %v3863_v12 }
0x1870   :  { %3609 = vmatpush3.msra.mxu1 %v4546_v5 }
0x1871   :  { %3624 = vmatprep.subr.mxu1 %v3863_v12 }
0x1925   :  { %v2342_v25 = vpop.f32.mrf.mxu0 }
0x1926   :  { %v2346_v57 = vadd.f32 %v2342_v25, %v4110_v62 }
0x1927   :  { %v3579_v61 = vpop.f32.mrf.mxu0 }
0x1928   :  { %3807 = vtanh.f32 %v2346_v57  ;;  %v3140_v60 = vmul.f32 -1.442695, %v2346_v57 }
0x1929   :  { %v2420_v42 = vpop.f32.mrf.mxu1 }
0x192a   :  { %v2424_v38 = vadd.f32 %v2420_v42, %v4096_v48 }
0x192b   :  { %v3590_v1 = vpop.f32.mrf.mxu1 }
0x192c   :  { %3809 = vtanh.f32 %v2424_v38  ;;  %v3141_v7 = vmul.f32 -1.442695, %v2424_v38 }
0x192d   :  { %3811 = vpow2.f32 %v3140_v60 }
0x192e   :  { %3813 = vpow2.f32 %v3141_v7 }
0x1935   :  { %v3808_v59 = vpop.eup %3807 }
0x1936   :  { %2434 = vrot.lane.b32.xlu0 %v3808_v59, %s3866_s4 }
0x1939   :  { %v3810_v50 = vpop.eup %3809 }
0x193a   :  { %2458 = vrot.lane.b32.xlu1 %v3810_v50, %s3866_s4  ;;  %v3812_v4 = vpop.eup %3811 }
0x193b   :  { %v2428_v8 = vadd.f32 1.0, %v3812_v4  ;;  %v3814_v62 = vpop.eup %3813 }
0x193c   :  { %v2452_v9 = vadd.f32 1.0, %v3814_v62 }
0x193d   :  { %3815 = vrcp.f32 %v2428_v8 }
0x193e   :  { %3817 = vrcp.f32 %v2452_v9 }
0x194a   :  { %v3816_v22 = vpop.eup %3815 }
0x194b   :  { %v3818_v30 = vpop.eup %3817  ;;  %v2432_v26 = vmul.f32 %v3816_v22, %v4758_v28 }
0x194c   :  { %v2456_v17 = vmul.f32 %v3818_v30, %v4767_v47 }
0x19a8   :  { %v2435_v48 = vpop.permute.xlu0 %2434 }
0x19a9   :  { %v2437_v63 = vmul.f32 %v3816_v22, %v2435_v48 }
0x19ab   :  { %2439 = vrot.lane.b32.xlu0 %v2437_v63, %s3866_s4 }
0x19ac   :  { %v2459_v33 = vpop.permute.xlu1 %2458 }
0x19ad   :  { %v2461_v21 = vmul.f32 %v3818_v30, %v2459_v33 }
0x19af   :  { %2463 = vrot.lane.b32.xlu1 %v2461_v21, %s3866_s4 }
0x1a1d   :  { %v2440_v41 = vpop.permute.xlu0 %2439 }
0x1a1e   :  { %v4761_v2 = vadd.f32 %v2440_v41, %v2432_v26 }
0x1a20   :  { %3819 = vtanh.f32 %v4761_v2  ;;  %v2476_v0 = vsel %vm2473_vm6, %v4761_v2, %v4758_v28 }
0x1a21   :  { %v2464_v44 = vpop.permute.xlu1 %2463 }
0x1a22   :  { %v4771_v34 = vadd.f32 %v2464_v44, %v2456_v17 }
0x1a24   :  { %3821 = vtanh.f32 %v4771_v34  ;;  %v2478_v42 = vsel %vm2474_vm7, %v4771_v34, %v4767_v47 }
0x1a2d   :  { %v3820_v10 = vpop.eup %3819 }
0x1a2e   :  { %2445 = vrot.lane.b32.xlu0 %v3820_v10, %s3866_s4 }
0x1a31   :  { %v3822_v14 = vpop.eup %3821 }
0x1a32   :  { %2469 = vrot.lane.b32.xlu1 %v3822_v14, %s3866_s4 }
0x1aa0   :  { %v2446_v16 = vpop.permute.xlu0 %2445 }
0x1aa1   :  { %v2448_v19 = vmul.f32 %v3816_v22, %v2446_v16 }
0x1aa3   :  { %v4780_v54 = vsel %vm2473_vm6, %v2448_v19, %v4714_v51 }
0x1aa4   :  { %2482 = vrot.lane.b32.xlu0 %v4780_v54, %s3867_s0  ;;  %v2470_v20 = vpop.permute.xlu1 %2469 }
0x1aa5   :  { %v2472_v24 = vmul.f32 %v3818_v30, %v2470_v20 }
0x1aa7   :  { %v4788_v56 = vsel %vm2474_vm7, %v2472_v24, %v4722_v53 }
0x1aa8   :  { %2560 = vrot.lane.b32.xlu1 %v4788_v56, %s3867_s0 }
0x1b16   :  { %v2483_v37 = vpop.permute.xlu0 %2482 }
0x1b17   :  { %3600 = vmatmul.mubr.msk.f32.vlgmr.msra.gmra.mxu0 %vm49_vm0, %v2483_v37 }
0x1b18   :  { %3614 = vmatpush3.msra.mxu0 %v4492_v35  ;;  %3621 = vmatprep.mubr.msk.f32.mxu0 %vm3864_vm1, %v3863_v12 }
0x1b19   :  { %3615 = vmatprep.subr.mxu0 %v3863_v12 }
0x1b1a   :  { %v2561_v23 = vpop.permute.xlu1 %2560  ;;  %3616 = vmatpush3.msra.mxu0 %v4501_v31 }
0x1b1b   :  { %3611 = vmatmul.mubr.msk.f32.vlgmr.msra.gmra.mxu1 %vm49_vm0, %v2561_v23  ;;  %3617 = vmatprep.subr.mxu0 %v3863_v12 }
0x1b1c   :  { %3618 = vmatpush3.msra.mxu0 %v4509_v3  ;;  %3625 = vmatpush3.msra.mxu1 %v4515_v45 }
0x1b1d   :  { %3619 = vmatprep.subr.mxu0 %v3863_v12  ;;  %3626 = vmatprep.subr.mxu1 %v3863_v12 }
0x1b1e   :  { %3620 = vmatpush3.msra.mxu0 %v4523_v39  ;;  %3627 = vmatpush3.msra.mxu1 %v4529_v15 }
0x1b1f   :  { %3628 = vmatprep.subr.mxu1 %v3863_v12  ;;  %3632 = vmatprep.mubr.msk.f32.mxu1 %vm3864_vm1, %v3863_v12 }
0x1b20   :  { %3629 = vmatpush3.msra.mxu1 %v4538_v29  ;;  %3635 = vmatprep.subr.mxu0 %v3863_v12 }
0x1b21   :  { %3630 = vmatprep.subr.mxu1 %v3863_v12 }
0x1b22   :  { %3631 = vmatpush3.msra.mxu1 %v4546_v5 }
0x1b23   :  { %3646 = vmatprep.subr.mxu1 %v3863_v12 }
0x1bd7   :  { %v2552_v35 = vpop.f32.mrf.mxu0 }
0x1bd8   :  { %v2556_v31 = vadd.f32 %v2552_v35, %v4122_v13 }
0x1bd9   :  { %v3601_v3 = vpop.f32.mrf.mxu0 }
0x1bda   :  { %3823 = vtanh.f32 %v2556_v31  ;;  %v3144_v58 = vmul.f32 -1.442695, %v2556_v31 }
0x1bdb   :  { %v2630_v45 = vpop.f32.mrf.mxu1 }
0x1bdc   :  { %v2634_v39 = vadd.f32 %v2630_v45, %v4084_v36 }
0x1bdd   :  { %v3612_v15 = vpop.f32.mrf.mxu1 }
0x1bde   :  { %3825 = vtanh.f32 %v2634_v39  ;;  %v3145_v5 = vmul.f32 -1.442695, %v2634_v39  ;;  %v2899_v15 = vld [vmem:[%s4913_s5 + $0x18] sm:$0xff] }
0x1bdf   :  { %3827 = vpow2.f32 %v3144_v58  ;;  %v3152_v58 = vld [vmem:[%s4913_s5 + $0x30] sm:$0xff] }
0x1be0   :  { %3829 = vpow2.f32 %v3145_v5  ;;  %v2897_v5 = vld [vmem:[%s4913_s5 + $0x8] sm:$0xff] }
0x1be7   :  { %v3824_v43 = vpop.eup %3823 }
0x1be8   :  { %2644 = vrot.lane.b32.xlu0 %v3824_v43, %s3866_s4  ;;  %v2898_v43 = vld [vmem:[%s4913_s5 + $0x10] sm:$0xff] }
0x1beb   :  { %v3826_v29 = vpop.eup %3825 }
0x1bec   :  { %2668 = vrot.lane.b32.xlu1 %v3826_v29, %s3866_s4  ;;  %v3828_v27 = vpop.eup %3827  ;;  %v3153_v29 = vld [vmem:[%s4913_s5 + $0x38] sm:$0xff] }
0x1bed   :  { %v2638_v49 = vadd.f32 1.0, %v3828_v27  ;;  %v3830_v13 = vpop.eup %3829 }
0x1bee   :  { %v2662_v52 = vadd.f32 1.0, %v3830_v13 }
0x1bef   :  { %3831 = vrcp.f32 %v2638_v49  ;;  %v2896_v49 = vld [vmem:[%s4913_s5] sm:$0xff] }
0x1bf0   :  { %3833 = vrcp.f32 %v2662_v52  ;;  %v3151_v52 = vld [vmem:[%s4913_s5 + $0x28] sm:$0xff] }
0x1bfc   :  { %v3832_v51 = vpop.eup %3831 }
0x1bfd   :  { %v3834_v32 = vpop.eup %3833  ;;  %v2642_v25 = vmul.f32 %v3832_v51, %v2476_v0 }
0x1bfe   :  { %v2666_v38 = vmul.f32 %v3834_v32, %v2478_v42 }
0x1c5a   :  { %v2645_v36 = vpop.permute.xlu0 %2644 }
0x1c5b   :  { %v2647_v46 = vmul.f32 %v3832_v51, %v2645_v36 }
0x1c5d   :  { %2649 = vrot.lane.b32.xlu0 %v2647_v46, %s3866_s4 }
0x1c5e   :  { %v2669_v53 = vpop.permute.xlu1 %2668 }
0x1c5f   :  { %v2671_v55 = vmul.f32 %v3834_v32, %v2669_v53 }
0x1c61   :  { %2673 = vrot.lane.b32.xlu1 %v2671_v55, %s3866_s4 }
0x1ccf   :  { %v2650_v57 = vpop.permute.xlu0 %2649 }
0x1cd0   :  { %v2652_v61 = vadd.f32 %v2650_v57, %v2642_v25 }
0x1cd2   :  { %3835 = vtanh.f32 %v2652_v61 }
0x1cd3   :  { %v2674_v1 = vpop.permute.xlu1 %2673 }
0x1cd4   :  { %v2676_v59 = vadd.f32 %v2674_v1, %v2666_v38 }
0x1cd6   :  { %3837 = vtanh.f32 %v2676_v59  ;;  %v2688_v31 = vsel %vm2684_vm9, %v2676_v59, %v2478_v42  ;;  %v3156_v42 = vld [vmem:[%s4914_s6] ss:$0 sm:$0xff] }
0x1cdf   :  { %v3836_v50 = vpop.eup %3835 }
0x1ce0   :  { %2655 = vrot.lane.b32.xlu0 %v3836_v50, %s3866_s4 }
0x1ce3   :  { %v3838_v60 = vpop.eup %3837 }
0x1ce4   :  { %2679 = vrot.lane.b32.xlu1 %v3838_v60, %s3866_s4 }
0x1d52   :  { %v2656_v7 = vpop.permute.xlu0 %2655 }
0x1d53   :  { %v2658_v4 = vmul.f32 %v3832_v51, %v2656_v7  ;;  %v3150_v51 = vld [vmem:[%s4913_s5 + $0x20] sm:$0xff] }
0x1d55   :  { %v4834_v8 = vsel %vm2683_vm8, %v2658_v4, %v4780_v54 }
0x1d56   :  { %2692 = vrot.lane.b32.xlu0 %v4834_v8, %s3867_s0  ;;  %v2680_v62 = vpop.permute.xlu1 %2679 }
0x1d57   :  { %v2682_v9 = vmul.f32 %v3834_v32, %v2680_v62 }
0x1d59   :  { %v4842_v22 = vsel %vm2684_vm9, %v2682_v9, %v4788_v56  ;;  %v2686_v56 = vsel %vm2683_vm8, %v2652_v61, %v2476_v0 }
0x1d5a   :  { %2769 = vrot.lane.b32.xlu1 %v4842_v22, %s3867_s0 }
0x1dc8   :  { %v2693_v48 = vpop.permute.xlu0 %2692 }
0x1dc9   :  { %3622 = vmatmul.mubr.msk.f32.vlgmr.msra.gmra.mxu0 %vm49_vm0, %v2693_v48 }
0x1dca   :  { %3643 = vmatprep.mubr.msk.f32.mxu0 %vm3864_vm1, %v3863_v12  ;;  %3636 = vmatpush3.msra.mxu0 %v3153_v29 }
0x1dcb   :  { %3637 = vmatprep.subr.mxu0 %v3863_v12 }
0x1dcc   :  { %v2770_v63 = vpop.permute.xlu1 %2769  ;;  %3638 = vmatpush3.msra.mxu0 %v3152_v58 }
0x1dcd   :  { %3633 = vmatmul.mubr.msk.f32.vlgmr.msra.gmra.mxu1 %vm49_vm0, %v2770_v63  ;;  %3639 = vmatprep.subr.mxu0 %v3863_v12 }
0x1dce   :  { %3654 = vmatprep.mubr.msk.f32.mxu1 %vm3864_vm1, %v3863_v12  ;;  %3647 = vmatpush3.msra.mxu1 %v2899_v15  ;;  %vm2892_vm1 = vcmp.gt.s32.totalorder %v4141_v11, 11 }
0x1dcf   :  { %3648 = vmatprep.subr.mxu1 %v3863_v12  ;;  %3640 = vmatpush3.msra.mxu0 %v3151_v52 }
0x1dd0   :  { %3649 = vmatpush3.msra.mxu1 %v2898_v43  ;;  %3641 = vmatprep.subr.mxu0 %v3863_v12 }
0x1dd1   :  { %3650 = vmatprep.subr.mxu1 %v3863_v12  ;;  %3642 = vmatpush3.msra.mxu0 %v3150_v51 }
0x1dd2   :  { %3651 = vmatpush3.msra.mxu1 %v2897_v5 }
0x1dd3   :  { %3652 = vmatprep.subr.mxu1 %v3863_v12 }
0x1dd4   :  { %3653 = vmatpush3.msra.mxu1 %v2896_v49 }
0x1e89   :  { %v2762_v30 = vpop.f32.mrf.mxu0 }
0x1e8a   :  { %v2766_v33 = vadd.f32 %v2762_v30, %v4118_v6 }
0x1e8b   :  { %v3623_v21 = vpop.f32.mrf.mxu0 }
0x1e8c   :  { %3839 = vtanh.f32 %v2766_v33  ;;  %v3148_v17 = vmul.f32 -1.442695, %v2766_v33 }
0x1e8d   :  { %v2839_v28 = vpop.f32.mrf.mxu1 }
0x1e8e   :  { %v2843_v26 = vadd.f32 %v2839_v28, %v4088_v40 }
0x1e8f   :  { %v3634_v41 = vpop.f32.mrf.mxu1 }
0x1e90   :  { %3841 = vtanh.f32 %v2843_v26  ;;  %v3149_v44 = vmul.f32 -1.442695, %v2843_v26 }
0x1e91   :  { %3843 = vpow2.f32 %v3148_v17 }
0x1e92   :  { %3845 = vpow2.f32 %v3149_v44 }
0x1e99   :  { %v3840_v2 = vpop.eup %3839 }
0x1e9a   :  { %2853 = vrot.lane.b32.xlu0 %v3840_v2, %s3866_s4 }
0x1e9d   :  { %v3842_v47 = vpop.eup %3841 }
0x1e9e   :  { %2877 = vrot.lane.b32.xlu1 %v3842_v47, %s3866_s4  ;;  %v3844_v34 = vpop.eup %3843 }
0x1e9f   :  { %v2847_v10 = vadd.f32 1.0, %v3844_v34  ;;  %v3846_v6 = vpop.eup %3845 }
0x1ea0   :  { %v2871_v14 = vadd.f32 1.0, %v3846_v6 }
0x1ea1   :  { %3847 = vrcp.f32 %v2847_v10 }
0x1ea2   :  { %3849 = vrcp.f32 %v2871_v14 }
0x1eae   :  { %v3848_v16 = vpop.eup %3847 }
0x1eaf   :  { %v3850_v54 = vpop.eup %3849  ;;  %v2851_v37 = vmul.f32 %v3848_v16, %v2686_v56 }
0x1eb0   :  { %v2875_v3 = vmul.f32 %v3850_v54, %v2688_v31 }
0x1f0c   :  { %v2854_v40 = vpop.permute.xlu0 %2853 }
0x1f0d   :  { %v2856_v19 = vmul.f32 %v3848_v16, %v2854_v40 }
0x1f0f   :  { %2858 = vrot.lane.b32.xlu0 %v2856_v19, %s3866_s4 }
0x1f10   :  { %v2878_v20 = vpop.permute.xlu1 %2877 }
0x1f11   :  { %v2880_v24 = vmul.f32 %v3850_v54, %v2878_v20 }
0x1f13   :  { %2882 = vrot.lane.b32.xlu1 %v2880_v24, %s3866_s4 }
0x1f81   :  { %v2859_v23 = vpop.permute.xlu0 %2858 }
0x1f82   :  { %v2861_v35 = vadd.f32 %v2859_v23, %v2851_v37 }
0x1f84   :  { %3851 = vtanh.f32 %v2861_v35 }
0x1f85   :  { %v2883_v45 = vpop.permute.xlu1 %2882 }
0x1f86   :  { %v2885_v39 = vadd.f32 %v2883_v45, %v2875_v3 }
0x1f88   :  { %3853 = vtanh.f32 %v2885_v39 }
0x1f91   :  { %v3852_v27 = vpop.eup %3851 }
0x1f92   :  { %2864 = vrot.lane.b32.xlu0 %v3852_v27, %s3866_s4 }
0x1f95   :  { %v3854_v13 = vpop.eup %3853 }
0x1f96   :  { %2888 = vrot.lane.b32.xlu1 %v3854_v13, %s3866_s4 }
0x2004   :  { %v2865_v36 = vpop.permute.xlu0 %2864 }
0x2005   :  { %v2867_v46 = vmul.f32 %v3848_v16, %v2865_v36 }
0x2007   :  { %v2894_v32 = vsel %vm2892_vm1, %v2867_v46, %v4834_v8 }
0x2008   :  { %2981 = vrot.lane.b32.xlu1 %v2894_v32, %s3867_s0  ;;  %v2889_v53 = vpop.permute.xlu1 %2888 }
0x2009   :  { %v2891_v55 = vmul.f32 %v3850_v54, %v2889_v53 }
0x200b   :  { %v2895_v0 = vsel %vm2893_vm10, %v2891_v55, %v4842_v22 }
0x200c   :  { %2906 = vrot.lane.b32.xlu0 %v2895_v0, %s3867_s0 }
0x207a   :  { %v2982_v25 = vpop.permute.xlu1 %2981 }
0x207b   :  { %3655 = vmatmul.mubr.msk.f32.vlgmr.msra.gmra.mxu1 %vm49_vm0, %v2982_v25 }
0x207e   :  { %v2907_v12 = vpop.permute.xlu0 %2906 }
0x207f   :  { %3644 = vmatmul.mubr.msk.f32.vlgmr.msra.gmra.mxu0 %vm49_vm0, %v2907_v12 }
0x213b   :  { %v3051_v57 = vpop.f32.mrf.mxu1 }
0x213d   :  { %v3656_v11 = vpop.f32.mrf.mxu1 }
0x213f   :  { %v2976_v61 = vpop.f32.mrf.mxu0 }
0x2140   :  { %v3052_v38 = vadd.f32 %v3051_v57, %v2976_v61 }
0x2141   :  { %v3645_v18 = vpop.f32.mrf.mxu0 }
0x2142   :  { %v3062_v1 = vadd.f32 %v3156_v42, %v3052_v38 }
0x2144   :  { %3064 = vst.msk [vmem:[%s4915_s7] sm:$0xff] %vm3063_vm11, %v3062_v1 }

</bundles_post_ra>
